<compile_context>
chip_gen: v5e
topology: v5e:2x2
jax: 0.10.0
libtpu: 0.0.40
codegen_flags: <defaults>
</compile_context>

<pallas_src>
import numpy as np
import jax
import jax.numpy as jnp
from jax.experimental import pallas as pl
from jax.experimental.pallas import tpu as pltpu

_INV_SQRT2 = 0.7071067811865476


def _gelu_exact(x):
    """PyTorch nn.GELU() default (erf-based).

    erf via Abramowitz & Stegun 7.1.26 rational approximation
    (max abs err ~1.5e-7).  The rational term's divide is an EUP approximate
    reciprocal refined with one Newton step, so the saturated VPU slot only
    sees two extra mul/fma instead of a full divide sequence.
    """
    a1, a2, a3, a4, a5 = (0.254829592, -0.284496736, 1.421413741,
                          -1.453152027, 1.061405429)
    p = 0.3275911
    z = jnp.abs(x) * _INV_SQRT2
    den = 1.0 + p * z
    r = pl.reciprocal(den, approx=True)       # EUP seed
    t = r * (2.0 - den * r)                   # one Newton step -> ~f32 exact
    poly = ((((a5 * t + a4) * t + a3) * t + a2) * t + a1) * t
    q = poly * jnp.exp(-z * z)                # q = 1 - erf(|x|/sqrt(2))
    cdf = jnp.where(x >= 0.0, 1.0 - 0.5 * q, 0.5 * q)
    return x * cdf


def _make_mlp_kernel(W, L):
    """One grid step over a lane-dense (C, L) activation slab (L = B*H*W)."""

    def mlp_kernel(x_ref, m_ref, g_ref, w1_ref, b1_ref, taps_ref, bp_ref,
                   w2_ref, b2_ref, o_ref):
        x = x_ref[0].astype(jnp.float32)                  # (C, L)
        C = x.shape[0]

        # ---- LayerNorm over each W-group (last axis of NCHW), eps=1e-6 ----
        # Single fused MXU push: [x ; x*x] @ M -> [mu ; E[x^2]].  M is the
        # (L, L) block-diagonal averaging matrix: it reduces within each
        # W-group AND broadcasts the statistic back to every lane.
        xx = jnp.concatenate([x, x * x], axis=0)          # (2C, L)
        stat = jnp.dot(xx, m_ref[...], preferred_element_type=jnp.float32)
        mu = stat[:C]
        var = jnp.maximum(stat[C:] - mu * mu, 0.0)        # clamp cancellation
        y = (x - mu) * jax.lax.rsqrt(var + 1e-6) * g_ref[...]
        # ln_b is folded into the fc1 bias plane (rank-1 term) in the wrapper.

        # ---- fc1 (1x1 conv) + GELU on the MXU ------------------------------
        a = _gelu_exact(jnp.dot(w1_ref[...], y,
                                preferred_element_type=jnp.float32)
                        + b1_ref[...])                    # (hidden, L)

        # ---- pos: depthwise 3x3, padding=1 ---------------------------------
        # 9 lane rolls (XLU slot, nearly free) times precomputed masked
        # tap-weight planes (hidden, L).  The masks also zero any cross-batch
        # leakage when several batch elements are folded into the lane axis.
        acc = a * taps_ref[4] + bp_ref[...]               # centre tap + bias
        for di in (-1, 0, 1):
            for dj in (-1, 0, 1):
                if di == 0 and dj == 0:
                    continue
                s = di * W + dj                           # flat lane shift
                k = 3 * (di + 1) + (dj + 1)
                acc = acc + pltpu.roll(a, (-s) % L, axis=1) * taps_ref[k]

        z = a + _gelu_exact(acc)                          # residual add

        # ---- fc2 (1x1 conv) on the MXU --------------------------------------
        out = jnp.dot(w2_ref[...], z, preferred_element_type=jnp.float32)
        o_ref[0] = (out + b2_ref[...]).astype(o_ref.dtype)

    return mlp_kernel


def _default_batch_block(N):
    """How many batch elements to fold into the lane axis per grid step.

    v7x has two TensorCores: keep one batch element per grid step so the
    "parallel" grid axis shards the batch across both cores.  v5e/v6e run the
    grid as a serial loop (~0.35 us/step fixed cost), so fold the whole batch
    into lanes and run a single step with 2x-wide (256-lane) matmuls.
    """
    try:
        kind = jax.devices()[0].device_kind.lower()
    except Exception:
        kind = ""
    if "v7" in kind or "7x" in kind:
        return 1
    return N


def mlp_pallas(x, params, batch_block=None):
    ln_g, ln_b, w1, b1, wp, bp, w2, b2 = params
    N, C, H, W = x.shape
    dim = C
    hidden = w1.shape[0]
    HW = H * W
    f32 = jnp.float32

    B = _default_batch_block(N) if batch_block is None else batch_block
    assert N % B == 0
    G = N // B
    L = B * HW

    # Lane-dense layout: (G, C, B*HW), lane = b_local*HW + h*W + w.
    # (Pure layout plumbing in the wrapper, outside the kernel.)
    x_l = x.reshape(G, B, C, HW).transpose(0, 2, 1, 3).reshape(G, C, L)

    # ---- shape-only constants (numpy, baked once) ---------------------------
    lane = np.arange(L)
    m = (lane[:, None] // W == lane[None, :] // W).astype(np.float32) / W
    h_idx = (lane % HW) // W
    w_idx = lane % W

    # ---- parameter prep: cast / reshape / pre-broadcast ONCE ----------------
    ln_g_v = jnp.asarray(ln_g, f32).reshape(-1)                    # (W,)
    ln_b_v = jnp.asarray(ln_b, f32).reshape(-1)
    g_plane = jnp.tile(ln_g_v, L // W).reshape(1, L)               # (1, L)
    lnb_lane = jnp.tile(ln_b_v, L // W)                            # (L,)

    w1f = jnp.asarray(w1, f32).reshape(hidden, dim)
    # Fold the LayerNorm bias through fc1 (rank-1 term) into the bias plane.
    b1_plane = (jnp.asarray(b1, f32).reshape(hidden, 1)
                + w1f.sum(axis=1, keepdims=True) * lnb_lane[None, :])

    wp9 = jnp.asarray(wp, f32).reshape(hidden, 9)
    tap_planes = []
    for di in (-1, 0, 1):
        for dj in (-1, 0, 1):
            k = 3 * (di + 1) + (dj + 1)
            mask = ((h_idx + di >= 0) & (h_idx + di < H) &
                    (w_idx + dj >= 0) & (w_idx + dj < W)).astype(np.float32)
            tap_planes.append(wp9[:, k:k + 1] * mask[None, :])     # (hid, L)
    taps = jnp.stack(tap_planes, axis=0)                           # (9,hid,L)
    bp_plane = jnp.broadcast_to(jnp.asarray(bp, f32).reshape(hidden, 1),
                                (hidden, L))
    w2f = jnp.asarray(w2, f32).reshape(dim, hidden)
    b2_plane = jnp.broadcast_to(jnp.asarray(b2, f32).reshape(dim, 1),
                                (dim, L))
    # NOTE: matmul operands are intentionally kept f32 — bf16 weights or
    # post-LN activations exceed the 1e-4 tolerance; kernel is not MXU bound.

    def cspec(arr):
        nd = arr.ndim
        return pl.BlockSpec(arr.shape, lambda g, _nd=nd: (0,) * _nd)

    # Advisory cost hint for the XLA scheduler.
    flops_step = (2 * (2 * C) * L * L            # fused LN stats matmul
                  + 2 * hidden * C * L           # fc1
                  + 2 * 9 * hidden * L           # depthwise 3x3 taps
                  + 2 * dim * hidden * L         # fc2
                  + 40 * hidden * L)             # elementwise / GELU
    trans_step = 4 * hidden * L                  # 2 GELUs * (exp + rcp)
    const_bytes = 4 * (L * L + L + hidden * (C + 11 * L) + dim * (hidden + L))
    bytes_accessed = 4 * 2 * N * C * HW + const_bytes

    out = pl.pallas_call(
        _make_mlp_kernel(W, L),
        out_shape=jax.ShapeDtypeStruct((G, dim, L), x.dtype),
        grid=(G,),
        in_specs=[pl.BlockSpec((1, C, L), lambda g: (g, 0, 0)),
                  cspec(m), cspec(g_plane), cspec(w1f), cspec(b1_plane),
                  cspec(taps), cspec(bp_plane), cspec(w2f), cspec(b2_plane)],
        out_specs=pl.BlockSpec((1, dim, L), lambda g: (g, 0, 0)),
        compiler_params=pltpu.CompilerParams(
            dimension_semantics=("parallel",)),   # shards batch on v7x's 2 TCs
        cost_estimate=pl.CostEstimate(
            flops=G * flops_step, transcendentals=G * trans_step,
            bytes_accessed=bytes_accessed),
    )(x_l, m, g_plane, w1f, b1_plane, taps, bp_plane, w2f, b2_plane)

    return (out.reshape(G, dim, B, HW).transpose(0, 2, 1, 3)
               .reshape(N, dim, H, W))


def mlp_reference(x, params):
    """Pure-JAX reference matching the PyTorch module semantics."""
    ln_g, ln_b, w1, b1, wp, bp, w2, b2 = params
    hidden = w1.shape[0]
    mu = x.mean(-1, keepdims=True)
    var = ((x - mu) ** 2).mean(-1, keepdims=True)
    y = (x - mu) / jnp.sqrt(var + 1e-6) * ln_g[0] + ln_b[0]
    h = jnp.einsum('oc,nchw->nohw', w1, y) + b1[:, 0][None, :, None, None]
    a = jax.nn.gelu(h, approximate=False)
    conv = jax.lax.conv_general_dilated(
        a, wp[:, None, :, :], window_strides=(1, 1),
        padding=((1, 1), (1, 1)), feature_group_count=hidden,
        dimension_numbers=('NCHW', 'OIHW', 'NCHW'))
    conv = conv + bp[:, 0][None, :, None, None]
    z = a + jax.nn.gelu(conv, approximate=False)
    out = jnp.einsum('oc,nchw->nohw', w2, z) + b2[:, 0][None, :, None, None]
    return out


if __name__ == "__main__":
    dim = 8
    mlp_ratio = 4
    hidden = dim * mlp_ratio
    N, H = 2, 16
    C = dim
    W = dim  # nn.LayerNorm(dim) on NCHW normalizes the last axis, so W == dim

    key = jax.random.PRNGKey(0)
    ks = jax.random.split(key, 9)
    x = jax.random.normal(ks[0], (N, C, H, W), jnp.float32)

    # Deterministic synthetic parameters (shapes follow the module __init__).
    ln_g = 1.0 + 0.1 * jax.random.normal(ks[1], (1, dim), jnp.float32)
    ln_b = 0.1 * jax.random.normal(ks[2], (1, dim), jnp.float32)
    w1 = 0.2 * jax.random.normal(ks[3], (hidden, dim), jnp.float32)   # fc1 (O,C,1,1)->(O,C)
    b1 = 0.1 * jax.random.normal(ks[4], (hidden, 1), jnp.float32)
    wp = 0.2 * jax.random.normal(ks[5], (hidden, 3, 3), jnp.float32)  # pos (O,1,3,3)->(O,3,3)
    bp = 0.1 * jax.random.normal(ks[6], (hidden, 1), jnp.float32)
    w2 = 0.2 * jax.random.normal(ks[7], (dim, hidden), jnp.float32)   # fc2 (O,C,1,1)->(O,C)
    b2 = 0.1 * jax.random.normal(ks[8], (dim, 1), jnp.float32)
    params = (ln_g, ln_b, w1, b1, wp, bp, w2, b2)

    out = mlp_pallas(x, params)
    jax.block_until_ready(out)

    ref = mlp_reference(x, params)
    np.testing.assert_allclose(np.asarray(out), np.asarray(ref),
                               rtol=1e-4, atol=1e-4)
    print("KERNEL_OK")
</pallas_src>

<mosaic_0001>
module attributes {stable_mosaic.version = 11 : i64} {
  func.func @mlp_kernel(%arg0: i32, %arg1: memref<1x8x256xf32, #tpu.memory_space<vmem>>, %arg2: memref<256x256xf32, #tpu.memory_space<vmem>>, %arg3: memref<1x256xf32, #tpu.memory_space<vmem>>, %arg4: memref<32x8xf32, #tpu.memory_space<vmem>>, %arg5: memref<32x256xf32, #tpu.memory_space<vmem>>, %arg6: memref<9x32x256xf32, #tpu.memory_space<vmem>>, %arg7: memref<32x256xf32, #tpu.memory_space<vmem>>, %arg8: memref<8x32xf32, #tpu.memory_space<vmem>>, %arg9: memref<8x256xf32, #tpu.memory_space<vmem>>, %arg10: memref<1x8x256xf32, #tpu.memory_space<vmem>>) attributes {dimension_semantics = [#tpu.dimension_semantics<parallel>], iteration_bounds = array<i64: 1>, scalar_prefetch = 0 : i64, scratch_operands = 0 : i64, tpu.core_type = #tpu.core_type<tc>, window_params = [{transform_indices = @transform_0, window_bounds = array<i64: 1, 8, 256>}, {pipeline_mode = #tpu.pipeline_mode<synchronous>, transform_indices = @transform_1, window_bounds = array<i64: 256, 256>}, {pipeline_mode = #tpu.pipeline_mode<synchronous>, transform_indices = @transform_2, window_bounds = array<i64: 1, 256>}, {pipeline_mode = #tpu.pipeline_mode<synchronous>, transform_indices = @transform_3, window_bounds = array<i64: 32, 8>}, {pipeline_mode = #tpu.pipeline_mode<synchronous>, transform_indices = @transform_4, window_bounds = array<i64: 32, 256>}, {pipeline_mode = #tpu.pipeline_mode<synchronous>, transform_indices = @transform_5, window_bounds = array<i64: 9, 32, 256>}, {pipeline_mode = #tpu.pipeline_mode<synchronous>, transform_indices = @transform_6, window_bounds = array<i64: 32, 256>}, {pipeline_mode = #tpu.pipeline_mode<synchronous>, transform_indices = @transform_7, window_bounds = array<i64: 8, 32>}, {pipeline_mode = #tpu.pipeline_mode<synchronous>, transform_indices = @transform_8, window_bounds = array<i64: 8, 256>}, {transform_indices = @transform_9, window_bounds = array<i64: 1, 8, 256>}]} {
    %c0 = arith.constant 0 : index
    %c0_0 = arith.constant 0 : index
    %c0_1 = arith.constant 0 : index
    %0 = vector.load %arg1[%c0, %c0_0, %c0_1] : memref<1x8x256xf32, #tpu.memory_space<vmem>>, vector<1x8x256xf32>
    %1 = vector.shape_cast %0 : vector<1x8x256xf32> to vector<8x256xf32>
    %2 = arith.mulf %1, %1 : vector<8x256xf32>
    %3 = tpu.concatenate %1, %2 in 0 : vector<8x256xf32>, vector<8x256xf32> -> vector<16x256xf32>
    %c0_2 = arith.constant 0 : index
    %c0_3 = arith.constant 0 : index
    %4 = vector.load %arg2[%c0_2, %c0_3] : memref<256x256xf32, #tpu.memory_space<vmem>>, vector<256x256xf32>
    %cst = arith.constant dense<0.000000e+00> : vector<16x256xf32>
    %5 = tpu.matmul %3, %4, %cst {dimension_numbers = #tpu.dot_dimension_numbers<[1], [0], [0], [1], [0, 0, 1, 1], [], []>} : vector<16x256xf32>, vector<256x256xf32>, vector<16x256xf32> -> vector<16x256xf32>
    %6 = vector.extract_strided_slice %5 {offsets = [0, 0], sizes = [8, 256], strides = [1, 1]} : vector<16x256xf32> to vector<8x256xf32>
    %7 = vector.extract_strided_slice %5 {offsets = [8, 0], sizes = [8, 256], strides = [1, 1]} : vector<16x256xf32> to vector<8x256xf32>
    %8 = arith.mulf %6, %6 : vector<8x256xf32>
    %9 = arith.subf %7, %8 : vector<8x256xf32>
    %cst_4 = arith.constant 0.000000e+00 : f32
    %10 = vector.broadcast %cst_4 : f32 to vector<8x256xf32>
    %11 = arith.maximumf %9, %10 : vector<8x256xf32>
    %12 = arith.subf %1, %6 : vector<8x256xf32>
    %cst_5 = arith.constant 9.99999997E-7 : f32
    %13 = vector.broadcast %cst_5 : f32 to vector<8x256xf32>
    %14 = arith.addf %11, %13 : vector<8x256xf32>
    %15 = math.rsqrt %14 : vector<8x256xf32>
    %16 = arith.mulf %12, %15 : vector<8x256xf32>
    %c0_6 = arith.constant 0 : index
    %c0_7 = arith.constant 0 : index
    %17 = vector.load %arg3[%c0_6, %c0_7] : memref<1x256xf32, #tpu.memory_space<vmem>>, vector<1x256xf32>
    %18 = vector.broadcast %17 : vector<1x256xf32> to vector<8x256xf32>
    %19 = arith.mulf %16, %18 : vector<8x256xf32>
    %c0_8 = arith.constant 0 : index
    %c0_9 = arith.constant 0 : index
    %20 = vector.load %arg4[%c0_8, %c0_9] : memref<32x8xf32, #tpu.memory_space<vmem>>, vector<32x8xf32>
    %cst_10 = arith.constant dense<0.000000e+00> : vector<32x256xf32>
    %21 = tpu.matmul %20, %19, %cst_10 {dimension_numbers = #tpu.dot_dimension_numbers<[1], [0], [0], [1], [0, 0, 1, 1], [], []>} : vector<32x8xf32>, vector<8x256xf32>, vector<32x256xf32> -> vector<32x256xf32>
    %c0_11 = arith.constant 0 : index
    %c0_12 = arith.constant 0 : index
    %22 = vector.load %arg5[%c0_11, %c0_12] : memref<32x256xf32, #tpu.memory_space<vmem>>, vector<32x256xf32>
    %23 = arith.addf %21, %22 : vector<32x256xf32>
    %24 = math.absf %23 : vector<32x256xf32>
    %cst_13 = arith.constant 0.707106769 : f32
    %25 = vector.broadcast %cst_13 : f32 to vector<32x256xf32>
    %26 = arith.mulf %24, %25 : vector<32x256xf32>
    %cst_14 = arith.constant 0.327591091 : f32
    %27 = vector.broadcast %cst_14 : f32 to vector<32x256xf32>
    %28 = arith.mulf %27, %26 : vector<32x256xf32>
    %cst_15 = arith.constant 1.000000e+00 : f32
    %29 = vector.broadcast %cst_15 : f32 to vector<32x256xf32>
    %30 = arith.addf %29, %28 : vector<32x256xf32>
    %31 = tpu.reciprocal %30 {approx = true} : vector<32x256xf32> -> vector<32x256xf32>
    %32 = arith.mulf %30, %31 : vector<32x256xf32>
    %cst_16 = arith.constant 2.000000e+00 : f32
    %33 = vector.broadcast %cst_16 : f32 to vector<32x256xf32>
    %34 = arith.subf %33, %32 : vector<32x256xf32>
    %35 = arith.mulf %31, %34 : vector<32x256xf32>
    %cst_17 = arith.constant 1.06140542 : f32
    %36 = vector.broadcast %cst_17 : f32 to vector<32x256xf32>
    %37 = arith.mulf %36, %35 : vector<32x256xf32>
    %cst_18 = arith.constant -1.45315206 : f32
    %38 = vector.broadcast %cst_18 : f32 to vector<32x256xf32>
    %39 = arith.addf %37, %38 : vector<32x256xf32>
    %40 = arith.mulf %39, %35 : vector<32x256xf32>
    %cst_19 = arith.constant 1.42141378 : f32
    %41 = vector.broadcast %cst_19 : f32 to vector<32x256xf32>
    %42 = arith.addf %40, %41 : vector<32x256xf32>
    %43 = arith.mulf %42, %35 : vector<32x256xf32>
    %cst_20 = arith.constant -0.284496725 : f32
    %44 = vector.broadcast %cst_20 : f32 to vector<32x256xf32>
    %45 = arith.addf %43, %44 : vector<32x256xf32>
    %46 = arith.mulf %45, %35 : vector<32x256xf32>
    %cst_21 = arith.constant 0.254829586 : f32
    %47 = vector.broadcast %cst_21 : f32 to vector<32x256xf32>
    %48 = arith.addf %46, %47 : vector<32x256xf32>
    %49 = arith.mulf %48, %35 : vector<32x256xf32>
    %cst_22 = arith.constant 0.000000e+00 : f32
    %50 = vector.broadcast %cst_22 : f32 to vector<32x256xf32>
    %51 = arith.subf %50, %26 : vector<32x256xf32>
    %52 = arith.mulf %51, %26 : vector<32x256xf32>
    %53 = math.exp %52 : vector<32x256xf32>
    %54 = arith.mulf %49, %53 : vector<32x256xf32>
    %cst_23 = arith.constant 0.000000e+00 : f32
    %55 = vector.broadcast %cst_23 : f32 to vector<32x256xf32>
    %56 = arith.cmpf oge, %23, %55 : vector<32x256xf32>
    %cst_24 = arith.constant 5.000000e-01 : f32
    %57 = vector.broadcast %cst_24 : f32 to vector<32x256xf32>
    %58 = arith.mulf %57, %54 : vector<32x256xf32>
    %cst_25 = arith.constant 1.000000e+00 : f32
    %59 = vector.broadcast %cst_25 : f32 to vector<32x256xf32>
    %60 = arith.subf %59, %58 : vector<32x256xf32>
    %cst_26 = arith.constant 5.000000e-01 : f32
    %61 = vector.broadcast %cst_26 : f32 to vector<32x256xf32>
    %62 = arith.mulf %61, %54 : vector<32x256xf32>
    %63 = arith.select %56, %60, %62 : vector<32x256xi1>, vector<32x256xf32>
    %64 = arith.mulf %23, %63 : vector<32x256xf32>
    %c4 = arith.constant 4 : index
    %c0_27 = arith.constant 0 : index
    %c0_28 = arith.constant 0 : index
    %65 = vector.load %arg6[%c4, %c0_27, %c0_28] : memref<9x32x256xf32, #tpu.memory_space<vmem>>, vector<1x32x256xf32>
    %66 = vector.shape_cast %65 : vector<1x32x256xf32> to vector<32x256xf32>
    %67 = arith.mulf %64, %66 : vector<32x256xf32>
    %c0_29 = arith.constant 0 : index
    %c0_30 = arith.constant 0 : index
    %68 = vector.load %arg7[%c0_29, %c0_30] : memref<32x256xf32, #tpu.memory_space<vmem>>, vector<32x256xf32>
    %69 = arith.addf %67, %68 : vector<32x256xf32>
    %c9_i32 = arith.constant 9 : i32
    %70 = tpu.dynamic_rotate %64 by %c9_i32 dim 1 : vector<32x256xf32>, i32 -> vector<32x256xf32>
    %c0_31 = arith.constant 0 : index
    %c0_32 = arith.constant 0 : index
    %c0_33 = arith.constant 0 : index
    %71 = vector.load %arg6[%c0_31, %c0_32, %c0_33] : memref<9x32x256xf32, #tpu.memory_space<vmem>>, vector<1x32x256xf32>
    %72 = vector.shape_cast %71 : vector<1x32x256xf32> to vector<32x256xf32>
    %73 = arith.mulf %70, %72 : vector<32x256xf32>
    %74 = arith.addf %69, %73 : vector<32x256xf32>
    %c8_i32 = arith.constant 8 : i32
    %75 = tpu.dynamic_rotate %64 by %c8_i32 dim 1 : vector<32x256xf32>, i32 -> vector<32x256xf32>
    %c1 = arith.constant 1 : index
    %c0_34 = arith.constant 0 : index
    %c0_35 = arith.constant 0 : index
    %76 = vector.load %arg6[%c1, %c0_34, %c0_35] : memref<9x32x256xf32, #tpu.memory_space<vmem>>, vector<1x32x256xf32>
    %77 = vector.shape_cast %76 : vector<1x32x256xf32> to vector<32x256xf32>
    %78 = arith.mulf %75, %77 : vector<32x256xf32>
    %79 = arith.addf %74, %78 : vector<32x256xf32>
    %c7_i32 = arith.constant 7 : i32
    %80 = tpu.dynamic_rotate %64 by %c7_i32 dim 1 : vector<32x256xf32>, i32 -> vector<32x256xf32>
    %c2 = arith.constant 2 : index
    %c0_36 = arith.constant 0 : index
    %c0_37 = arith.constant 0 : index
    %81 = vector.load %arg6[%c2, %c0_36, %c0_37] : memref<9x32x256xf32, #tpu.memory_space<vmem>>, vector<1x32x256xf32>
    %82 = vector.shape_cast %81 : vector<1x32x256xf32> to vector<32x256xf32>
    %83 = arith.mulf %80, %82 : vector<32x256xf32>
    %84 = arith.addf %79, %83 : vector<32x256xf32>
    %c1_i32 = arith.constant 1 : i32
    %85 = tpu.dynamic_rotate %64 by %c1_i32 dim 1 : vector<32x256xf32>, i32 -> vector<32x256xf32>
    %c3 = arith.constant 3 : index
    %c0_38 = arith.constant 0 : index
    %c0_39 = arith.constant 0 : index
    %86 = vector.load %arg6[%c3, %c0_38, %c0_39] : memref<9x32x256xf32, #tpu.memory_space<vmem>>, vector<1x32x256xf32>
    %87 = vector.shape_cast %86 : vector<1x32x256xf32> to vector<32x256xf32>
    %88 = arith.mulf %85, %87 : vector<32x256xf32>
    %89 = arith.addf %84, %88 : vector<32x256xf32>
    %c255_i32 = arith.constant 255 : i32
    %90 = tpu.dynamic_rotate %64 by %c255_i32 dim 1 : vector<32x256xf32>, i32 -> vector<32x256xf32>
    %c5 = arith.constant 5 : index
    %c0_40 = arith.constant 0 : index
    %c0_41 = arith.constant 0 : index
    %91 = vector.load %arg6[%c5, %c0_40, %c0_41] : memref<9x32x256xf32, #tpu.memory_space<vmem>>, vector<1x32x256xf32>
    %92 = vector.shape_cast %91 : vector<1x32x256xf32> to vector<32x256xf32>
    %93 = arith.mulf %90, %92 : vector<32x256xf32>
    %94 = arith.addf %89, %93 : vector<32x256xf32>
    %c249_i32 = arith.constant 249 : i32
    %95 = tpu.dynamic_rotate %64 by %c249_i32 dim 1 : vector<32x256xf32>, i32 -> vector<32x256xf32>
    %c6 = arith.constant 6 : index
    %c0_42 = arith.constant 0 : index
    %c0_43 = arith.constant 0 : index
    %96 = vector.load %arg6[%c6, %c0_42, %c0_43] : memref<9x32x256xf32, #tpu.memory_space<vmem>>, vector<1x32x256xf32>
    %97 = vector.shape_cast %96 : vector<1x32x256xf32> to vector<32x256xf32>
    %98 = arith.mulf %95, %97 : vector<32x256xf32>
    %99 = arith.addf %94, %98 : vector<32x256xf32>
    %c248_i32 = arith.constant 248 : i32
    %100 = tpu.dynamic_rotate %64 by %c248_i32 dim 1 : vector<32x256xf32>, i32 -> vector<32x256xf32>
    %c7 = arith.constant 7 : index
    %c0_44 = arith.constant 0 : index
    %c0_45 = arith.constant 0 : index
    %101 = vector.load %arg6[%c7, %c0_44, %c0_45] : memref<9x32x256xf32, #tpu.memory_space<vmem>>, vector<1x32x256xf32>
    %102 = vector.shape_cast %101 : vector<1x32x256xf32> to vector<32x256xf32>
    %103 = arith.mulf %100, %102 : vector<32x256xf32>
    %104 = arith.addf %99, %103 : vector<32x256xf32>
    %c247_i32 = arith.constant 247 : i32
    %105 = tpu.dynamic_rotate %64 by %c247_i32 dim 1 : vector<32x256xf32>, i32 -> vector<32x256xf32>
    %c8 = arith.constant 8 : index
    %c0_46 = arith.constant 0 : index
    %c0_47 = arith.constant 0 : index
    %106 = vector.load %arg6[%c8, %c0_46, %c0_47] : memref<9x32x256xf32, #tpu.memory_space<vmem>>, vector<1x32x256xf32>
    %107 = vector.shape_cast %106 : vector<1x32x256xf32> to vector<32x256xf32>
    %108 = arith.mulf %105, %107 : vector<32x256xf32>
    %109 = arith.addf %104, %108 : vector<32x256xf32>
    %110 = math.absf %109 : vector<32x256xf32>
    %cst_48 = arith.constant 0.707106769 : f32
    %111 = vector.broadcast %cst_48 : f32 to vector<32x256xf32>
    %112 = arith.mulf %110, %111 : vector<32x256xf32>
    %cst_49 = arith.constant 0.327591091 : f32
    %113 = vector.broadcast %cst_49 : f32 to vector<32x256xf32>
    %114 = arith.mulf %113, %112 : vector<32x256xf32>
    %cst_50 = arith.constant 1.000000e+00 : f32
    %115 = vector.broadcast %cst_50 : f32 to vector<32x256xf32>
    %116 = arith.addf %115, %114 : vector<32x256xf32>
    %117 = tpu.reciprocal %116 {approx = true} : vector<32x256xf32> -> vector<32x256xf32>
    %118 = arith.mulf %116, %117 : vector<32x256xf32>
    %cst_51 = arith.constant 2.000000e+00 : f32
    %119 = vector.broadcast %cst_51 : f32 to vector<32x256xf32>
    %120 = arith.subf %119, %118 : vector<32x256xf32>
    %121 = arith.mulf %117, %120 : vector<32x256xf32>
    %cst_52 = arith.constant 1.06140542 : f32
    %122 = vector.broadcast %cst_52 : f32 to vector<32x256xf32>
    %123 = arith.mulf %122, %121 : vector<32x256xf32>
    %cst_53 = arith.constant -1.45315206 : f32
    %124 = vector.broadcast %cst_53 : f32 to vector<32x256xf32>
    %125 = arith.addf %123, %124 : vector<32x256xf32>
    %126 = arith.mulf %125, %121 : vector<32x256xf32>
    %cst_54 = arith.constant 1.42141378 : f32
    %127 = vector.broadcast %cst_54 : f32 to vector<32x256xf32>
    %128 = arith.addf %126, %127 : vector<32x256xf32>
    %129 = arith.mulf %128, %121 : vector<32x256xf32>
    %cst_55 = arith.constant -0.284496725 : f32
    %130 = vector.broadcast %cst_55 : f32 to vector<32x256xf32>
    %131 = arith.addf %129, %130 : vector<32x256xf32>
    %132 = arith.mulf %131, %121 : vector<32x256xf32>
    %cst_56 = arith.constant 0.254829586 : f32
    %133 = vector.broadcast %cst_56 : f32 to vector<32x256xf32>
    %134 = arith.addf %132, %133 : vector<32x256xf32>
    %135 = arith.mulf %134, %121 : vector<32x256xf32>
    %cst_57 = arith.constant 0.000000e+00 : f32
    %136 = vector.broadcast %cst_57 : f32 to vector<32x256xf32>
    %137 = arith.subf %136, %112 : vector<32x256xf32>
    %138 = arith.mulf %137, %112 : vector<32x256xf32>
    %139 = math.exp %138 : vector<32x256xf32>
    %140 = arith.mulf %135, %139 : vector<32x256xf32>
    %cst_58 = arith.constant 0.000000e+00 : f32
    %141 = vector.broadcast %cst_58 : f32 to vector<32x256xf32>
    %142 = arith.cmpf oge, %109, %141 : vector<32x256xf32>
    %cst_59 = arith.constant 5.000000e-01 : f32
    %143 = vector.broadcast %cst_59 : f32 to vector<32x256xf32>
    %144 = arith.mulf %143, %140 : vector<32x256xf32>
    %cst_60 = arith.constant 1.000000e+00 : f32
    %145 = vector.broadcast %cst_60 : f32 to vector<32x256xf32>
    %146 = arith.subf %145, %144 : vector<32x256xf32>
    %cst_61 = arith.constant 5.000000e-01 : f32
    %147 = vector.broadcast %cst_61 : f32 to vector<32x256xf32>
    %148 = arith.mulf %147, %140 : vector<32x256xf32>
    %149 = arith.select %142, %146, %148 : vector<32x256xi1>, vector<32x256xf32>
    %150 = arith.mulf %109, %149 : vector<32x256xf32>
    %151 = arith.addf %64, %150 : vector<32x256xf32>
    %c0_62 = arith.constant 0 : index
    %c0_63 = arith.constant 0 : index
    %152 = vector.load %arg8[%c0_62, %c0_63] : memref<8x32xf32, #tpu.memory_space<vmem>>, vector<8x32xf32>
    %cst_64 = arith.constant dense<0.000000e+00> : vector<8x256xf32>
    %153 = tpu.matmul %152, %151, %cst_64 {dimension_numbers = #tpu.dot_dimension_numbers<[1], [0], [0], [1], [0, 0, 1, 1], [], []>} : vector<8x32xf32>, vector<32x256xf32>, vector<8x256xf32> -> vector<8x256xf32>
    %c0_65 = arith.constant 0 : index
    %c0_66 = arith.constant 0 : index
    %154 = vector.load %arg9[%c0_65, %c0_66] : memref<8x256xf32, #tpu.memory_space<vmem>>, vector<8x256xf32>
    %155 = arith.addf %153, %154 : vector<8x256xf32>
    %c0_67 = arith.constant 0 : index
    %c0_68 = arith.constant 0 : index
    %c0_69 = arith.constant 0 : index
    %156 = vector.load %arg10[%c0_67, %c0_68, %c0_69] : memref<1x8x256xf32, #tpu.memory_space<vmem>>, vector<1x8x256xf32>
    %157 = vector.shape_cast %156 : vector<1x8x256xf32> to vector<8x256xf32>
    %158 = vector.shape_cast %155 : vector<8x256xf32> to vector<1x8x256xf32>
    tpu.vector_store %arg10[%c0_67, %c0_68, %c0_69], %158 {strides = array<i32>} : memref<1x8x256xf32, #tpu.memory_space<vmem>>, vector<1x8x256xf32>,
    return
  }
  func.func @transform_0(%arg0: i32) -> (i32, i32, i32) {
    %c0_i32 = arith.constant 0 : i32
    %c0_i32_0 = arith.constant 0 : i32
    %c0_i32_1 = arith.constant 0 : i32
    return %arg0, %c0_i32, %c0_i32_0 : i32, i32, i32
  }
  func.func @transform_1(%arg0: i32) -> (i32, i32) {
    %c0_i32 = arith.constant 0 : i32
    %c0_i32_0 = arith.constant 0 : i32
    %c0_i32_1 = arith.constant 0 : i32
    return %c0_i32, %c0_i32_0 : i32, i32
  }
  func.func @transform_2(%arg0: i32) -> (i32, i32) {
    %c0_i32 = arith.constant 0 : i32
    %c0_i32_0 = arith.constant 0 : i32
    %c0_i32_1 = arith.constant 0 : i32
    return %c0_i32, %c0_i32_0 : i32, i32
  }
  func.func @transform_3(%arg0: i32) -> (i32, i32) {
    %c0_i32 = arith.constant 0 : i32
    %c0_i32_0 = arith.constant 0 : i32
    %c0_i32_1 = arith.constant 0 : i32
    return %c0_i32, %c0_i32_0 : i32, i32
  }
  func.func @transform_4(%arg0: i32) -> (i32, i32) {
    %c0_i32 = arith.constant 0 : i32
    %c0_i32_0 = arith.constant 0 : i32
    %c0_i32_1 = arith.constant 0 : i32
    return %c0_i32, %c0_i32_0 : i32, i32
  }
  func.func @transform_5(%arg0: i32) -> (i32, i32, i32) {
    %c0_i32 = arith.constant 0 : i32
    %c0_i32_0 = arith.constant 0 : i32
    %c0_i32_1 = arith.constant 0 : i32
    %c0_i32_2 = arith.constant 0 : i32
    return %c0_i32, %c0_i32_0, %c0_i32_1 : i32, i32, i32
  }
  func.func @transform_6(%arg0: i32) -> (i32, i32) {
    %c0_i32 = arith.constant 0 : i32
    %c0_i32_0 = arith.constant 0 : i32
    %c0_i32_1 = arith.constant 0 : i32
    return %c0_i32, %c0_i32_0 : i32, i32
  }
  func.func @transform_7(%arg0: i32) -> (i32, i32) {
    %c0_i32 = arith.constant 0 : i32
    %c0_i32_0 = arith.constant 0 : i32
    %c0_i32_1 = arith.constant 0 : i32
    return %c0_i32, %c0_i32_0 : i32, i32
  }
  func.func @transform_8(%arg0: i32) -> (i32, i32) {
    %c0_i32 = arith.constant 0 : i32
    %c0_i32_0 = arith.constant 0 : i32
    %c0_i32_1 = arith.constant 0 : i32
    return %c0_i32, %c0_i32_0 : i32, i32
  }
  func.func @transform_9(%arg0: i32) -> (i32, i32, i32) {
    %c0_i32 = arith.constant 0 : i32
    %c0_i32_0 = arith.constant 0 : i32
    %c0_i32_1 = arith.constant 0 : i32
    return %arg0, %c0_i32, %c0_i32_0 : i32, i32, i32
  }
}

</mosaic_0001>

<bundles_post_ra>
// kernel: tpu_custom_call.1
= control target key start
LH: loop header
LB: loop body
LE: loop exit
PB: predicated region body
PF: predicated region fallthrough
CT: control target
= control target key end

     0   :  { %14 = vsyncpa [#allocation3], 0  ;;  %s2360_s0 = inlined_call_operand.vmem [shape: f32[1,8,256], index: 0, kind: input, shape index: {}]   ;;  %s2361_s1 = inlined_call_operand.hbm [shape: f32[256,256], index: 1, kind: input, shape index: {}]   ;;  %s2362_s2 = inlined_call_operand.hbm [shape: f32[1,256], index: 2, kind: input, shape index: {}]   ;;  %s2363_s3 = inlined_call_operand.vmem [shape: f32[32,8], index: 3, kind: input, shape index: {}]   ;;  %s2364_s4 = inlined_call_operand.hbm [shape: f32[32,256], index: 4, kind: input, shape index: {}]   ;;  %s2365_s5 = inlined_call_operand.hbm [shape: f32[9,32,256], index: 5, kind: input, shape index: {}]   ;;  %s2366_s6 = inlined_call_operand.hbm [shape: f32[32,256], index: 6, kind: input, shape index: {}]   ;;  %s2367_s7 = inlined_call_operand.vmem [shape: f32[8,32], index: 7, kind: input, shape index: {}]   ;;  %s2368_s8 = inlined_call_operand.vmem [shape: f32[8,256], index: 8, kind: input, shape index: {}]   ;;  %s2369_s9 = inlined_call_operand.hbm [shape: f32[1,8,256], index: 9, kind: output, shape index: {}]  }
   0x1   :  { %15 = vsyncpa [#allocation6], 0 }
   0x2   :  { %16 = vsyncpa [#allocation9], 0  ;;  %s38_s11 = sshll.u32 %s2362_s2, 4  ;;  %s39_s11 = int_to_ptr.hbm [resolvable:$true] %s38_s11 }
   0x3   :  { %17 = vsyncpa [#allocation4], 0  ;;  %s1582_s12 = smov [#allocation5]   ;;  %s63_s16 = sshll.u32 %s2365_s5, 4  ;;  %s64_s16 = int_to_ptr.hbm [resolvable:$true] %s63_s16 }
   0x4   :  { %s40_s13 = sshll.u32 %s1582_s12, 4  ;;  %s1583_s17 = smov [#allocation8]   ;;  %s41_s13 = int_to_ptr.vmem [resolvable:$true] %s40_s13 }
   0x5   :  { %43 = dma.hbm_to_vmem [thread:$0]  %s39_s11, 32, %s41_s13, [#allocation6]  }
   0x6   :  { %s65_s18 = sshll.u32 %s1583_s17, 4  ;;  %s24_s21 = sshll.u32 %s2361_s1, 4  ;;  %s66_s18 = int_to_ptr.vmem [resolvable:$true] %s65_s18  ;;  %s25_s21 = int_to_ptr.hbm [resolvable:$true] %s24_s21 }
   0x7   :  { %s1584_s2 = smov 256   ;;  %s1585_s22 = smov 16  }
   0x8   :  { %71 = dma.hbm_to_vmem [thread:$0]  %s64_s16, 9216, %s66_s18, [#allocation9], %s1584_s2, %s1584_s2, %s1585_s22  }
   0x9   :  { %s50_s25 = sshll.u32 %s2364_s4, 4  ;;  %s1586_s26 = smov [#allocation2]   ;;  %s51_s25 = int_to_ptr.hbm [resolvable:$true] %s50_s25 }
   0xa   :  { %s26_s27 = sshll.u32 %s1586_s26, 4  ;;  %s1587_s5 = smov [#allocation7]   ;;  %s27_s27 = int_to_ptr.vmem [resolvable:$true] %s26_s27 }
   0xb   :  { %32 = dma.hbm_to_vmem [thread:$0]  %s25_s21, 8192, %s27_s27, [#allocation3], %s1584_s2, %s1584_s2, %s1585_s22  }
   0xc   :  { %s52_s28 = sshll.u32 %s1587_s5, 4  ;;  %s76_s1 = sshll.u32 %s2366_s6, 4  ;;  %s53_s28 = int_to_ptr.vmem [resolvable:$true] %s52_s28  ;;  %s77_s1 = int_to_ptr.hbm [resolvable:$true] %s76_s1 }
   0xd   :  { %58 = dma.hbm_to_vmem [thread:$0]  %s51_s25, 1024, %s53_s28, [#allocation6], %s1584_s2, %s1584_s2, %s1585_s22  }
   0xe   :  { %s1588_s10 = smov [#allocation10]  }
   0xf   :  { %s78_s11 = sshll.u32 %s1588_s10, 4  ;;  %s79_s11 = int_to_ptr.vmem [resolvable:$true] %s78_s11 }
  0x10   :  { %84 = dma.hbm_to_vmem [thread:$0]  %s77_s1, 1024, %s79_s11, [#allocation9], %s1584_s2, %s1584_s2, %s1585_s22  }
  0x11   :  { %1574 = dma.done.wait [#allocation3], 8192  }
  0x12   :  { %1575 = vsyncadd [#allocation3], 4294959104 }
  0x13   :  { %1576 = dma.done.wait [#allocation6], 1056  }
  0x14   :  { %1577 = vsyncadd [#allocation6], 4294966240 }
  0x15   :  { %1578 = dma.done.wait [#allocation9], 10240  }
  0x16   :  { %1579 = vsyncadd [#allocation9], 4294957056  ;;  %v143_v0 = vld [vmem:[#allocation2 + $0xf0] sm:$0xff]  ;;  %v144_v2 = vld [vmem:[#allocation2 + $0xf8] sm:$0xff]  ;;  %vm321_vm5 = vcmask 64512   ;;  %s1590_s21 = smov 8  }
  0x17   :  { %v175_v1 = vld [vmem:[#allocation2 + $0x1f0] sm:$0xff]  ;;  %177 = vmatpush.msra.mxu0 %v143_v0  ;;  %v176_v3 = vld [vmem:[#allocation2 + $0x1f8] sm:$0xff]  ;;  %v141_v4 = vld [vmem:[#allocation2 + $0xe0] sm:$0xff]  ;;  %223 = vmatpush.msra.mxu2 %v144_v2  ;;  %s1591_s2 = smov 9   ;;  %s1592_s22 = smov 121  }
  0x18   :  { %200 = vmatpush.msra.mxu1 %v175_v1  ;;  %v173_v5 = vld [vmem:[#allocation2 + $0x1e0] sm:$0xff]  ;;  %246 = vmatpush.msra.mxu3 %v176_v3  ;;  %v142_v6 = vld [vmem:[#allocation2 + $0xe8] sm:$0xff]  ;;  %v139_v8 = vld [vmem:[#allocation2 + $0xd0] sm:$0xff]  ;;  %s1593_s23 = smov 127   ;;  %s1594_s24 = smov 1  }
  0x19   :  { %v174_v7 = vld [vmem:[#allocation2 + $0x1e8] sm:$0xff]  ;;  %178 = vmatpush.msra.mxu0 %v141_v4  ;;  %v171_v9 = vld [vmem:[#allocation2 + $0x1d0] sm:$0xff]  ;;  %v140_v10 = vld [vmem:[#allocation2 + $0xd8] sm:$0xff]  ;;  %224 = vmatpush.msra.mxu2 %v142_v6  ;;  %s1595_s25 = smov 120   ;;  %s1596_s26 = smov 119  }
  0x1a   :  { %201 = vmatpush.msra.mxu1 %v173_v5  ;;  %v172_v11 = vld [vmem:[#allocation2 + $0x1d8] sm:$0xff]  ;;  %247 = vmatpush.msra.mxu3 %v174_v7  ;;  %v137_v12 = vld [vmem:[#allocation2 + $0xc0] sm:$0xff]  ;;  %v138_v14 = vld [vmem:[#allocation2 + $0xc8] sm:$0xff]  ;;  %s1322_s6 = sshll.u32 %s2369_s9, 4  ;;  %s1323_s6 = int_to_ptr.hbm [resolvable:$true] %s1322_s6 }
  0x1b   :  { %v169_v13 = vld [vmem:[#allocation2 + $0x1c0] sm:$0xff]  ;;  %179 = vmatpush.msra.mxu0 %v139_v8  ;;  %v170_v15 = vld [vmem:[#allocation2 + $0x1c8] sm:$0xff]  ;;  %225 = vmatpush.msra.mxu2 %v140_v10  ;;  %v135_v16 = vld [vmem:[#allocation2 + $0xb0] sm:$0xff] }
  0x1c   :  { %202 = vmatpush.msra.mxu1 %v171_v9  ;;  %248 = vmatpush.msra.mxu3 %v172_v11  ;;  %v167_v17 = vld [vmem:[#allocation2 + $0x1b0] sm:$0xff]  ;;  %v136_v18 = vld [vmem:[#allocation2 + $0xb8] sm:$0xff]  ;;  %v133_v20 = vld [vmem:[#allocation2 + $0xa0] sm:$0xff] }
  0x1d   :  { %180 = vmatpush.msra.mxu0 %v137_v12  ;;  %v168_v19 = vld [vmem:[#allocation2 + $0x1b8] sm:$0xff]  ;;  %226 = vmatpush.msra.mxu2 %v138_v14  ;;  %v165_v21 = vld [vmem:[#allocation2 + $0x1a0] sm:$0xff]  ;;  %v134_v22 = vld [vmem:[#allocation2 + $0xa8] sm:$0xff] }
  0x1e   :  { %203 = vmatpush.msra.mxu1 %v169_v13  ;;  %249 = vmatpush.msra.mxu3 %v170_v15  ;;  %v166_v23 = vld [vmem:[#allocation2 + $0x1a8] sm:$0xff]  ;;  %v131_v24 = vld [vmem:[#allocation2 + $0x90] sm:$0xff]  ;;  %v132_v26 = vld [vmem:[#allocation2 + $0x98] sm:$0xff] }
  0x1f   :  { %181 = vmatpush.msra.mxu0 %v135_v16  ;;  %227 = vmatpush.msra.mxu2 %v136_v18  ;;  %v163_v25 = vld [vmem:[#allocation2 + $0x190] sm:$0xff]  ;;  %v164_v27 = vld [vmem:[#allocation2 + $0x198] sm:$0xff]  ;;  %v129_v28 = vld [vmem:[#allocation2 + $0x80] sm:$0xff] }
  0x20   :  { %204 = vmatpush.msra.mxu1 %v167_v17  ;;  %250 = vmatpush.msra.mxu3 %v168_v19  ;;  %v161_v29 = vld [vmem:[#allocation2 + $0x180] sm:$0xff]  ;;  %v130_v30 = vld [vmem:[#allocation2 + $0x88] sm:$0xff]  ;;  %v127_v32 = vld [vmem:[#allocation2 + $0x70] sm:$0xff] }
  0x21   :  { %182 = vmatpush.msra.mxu0 %v133_v20  ;;  %228 = vmatpush.msra.mxu2 %v134_v22  ;;  %v162_v31 = vld [vmem:[#allocation2 + $0x188] sm:$0xff]  ;;  %v159_v33 = vld [vmem:[#allocation2 + $0x170] sm:$0xff]  ;;  %v128_v34 = vld [vmem:[#allocation2 + $0x78] sm:$0xff] }
  0x22   :  { %205 = vmatpush.msra.mxu1 %v165_v21  ;;  %251 = vmatpush.msra.mxu3 %v166_v23  ;;  %v160_v35 = vld [vmem:[#allocation2 + $0x178] sm:$0xff]  ;;  %v125_v36 = vld [vmem:[#allocation2 + $0x60] sm:$0xff]  ;;  %v126_v38 = vld [vmem:[#allocation2 + $0x68] sm:$0xff] }
  0x23   :  { %183 = vmatpush.msra.mxu0 %v131_v24  ;;  %229 = vmatpush.msra.mxu2 %v132_v26  ;;  %v157_v37 = vld [vmem:[#allocation2 + $0x160] sm:$0xff]  ;;  %v158_v39 = vld [vmem:[#allocation2 + $0x168] sm:$0xff]  ;;  %v123_v40 = vld [vmem:[#allocation2 + $0x50] sm:$0xff] }
  0x24   :  { %206 = vmatpush.msra.mxu1 %v163_v25  ;;  %252 = vmatpush.msra.mxu3 %v164_v27  ;;  %v155_v41 = vld [vmem:[#allocation2 + $0x150] sm:$0xff]  ;;  %v124_v42 = vld [vmem:[#allocation2 + $0x58] sm:$0xff]  ;;  %v121_v44 = vld [vmem:[#allocation2 + $0x40] sm:$0xff] }
  0x25   :  { %184 = vmatpush.msra.mxu0 %v129_v28  ;;  %230 = vmatpush.msra.mxu2 %v130_v30  ;;  %v156_v43 = vld [vmem:[#allocation2 + $0x158] sm:$0xff]  ;;  %v153_v45 = vld [vmem:[#allocation2 + $0x140] sm:$0xff]  ;;  %v122_v46 = vld [vmem:[#allocation2 + $0x48] sm:$0xff] }
  0x26   :  { %207 = vmatpush.msra.mxu1 %v161_v29  ;;  %253 = vmatpush.msra.mxu3 %v162_v31  ;;  %v154_v47 = vld [vmem:[#allocation2 + $0x148] sm:$0xff]  ;;  %v119_v48 = vld [vmem:[#allocation2 + $0x30] sm:$0xff]  ;;  %v120_v50 = vld [vmem:[#allocation2 + $0x38] sm:$0xff] }
  0x27   :  { %185 = vmatpush.msra.mxu0 %v127_v32  ;;  %231 = vmatpush.msra.mxu2 %v128_v34  ;;  %v151_v49 = vld [vmem:[#allocation2 + $0x130] sm:$0xff]  ;;  %v152_v51 = vld [vmem:[#allocation2 + $0x138] sm:$0xff]  ;;  %v117_v52 = vld [vmem:[#allocation2 + $0x20] sm:$0xff] }
  0x28   :  { %208 = vmatpush.msra.mxu1 %v159_v33  ;;  %254 = vmatpush.msra.mxu3 %v160_v35  ;;  %v149_v53 = vld [vmem:[#allocation2 + $0x120] sm:$0xff]  ;;  %v118_v54 = vld [vmem:[#allocation2 + $0x28] sm:$0xff]  ;;  %v115_v56 = vld [vmem:[#allocation2 + $0x10] sm:$0xff] }
  0x29   :  { %186 = vmatpush.msra.mxu0 %v125_v36  ;;  %232 = vmatpush.msra.mxu2 %v126_v38  ;;  %v150_v55 = vld [vmem:[#allocation2 + $0x128] sm:$0xff]  ;;  %v147_v57 = vld [vmem:[#allocation2 + $0x110] sm:$0xff]  ;;  %v116_v58 = vld [vmem:[#allocation2 + $0x18] sm:$0xff] }
  0x2a   :  { %209 = vmatpush.msra.mxu1 %v157_v37  ;;  %255 = vmatpush.msra.mxu3 %v158_v39  ;;  %v148_v59 = vld [vmem:[#allocation2 + $0x118] sm:$0xff]  ;;  %v113_v60 = vld [vmem:[#allocation2] sm:$0xff]  ;;  %v114_v62 = vld [vmem:[#allocation2 + $0x8] sm:$0xff] }
  0x2b   :  { %187 = vmatpush.msra.mxu0 %v123_v40  ;;  %233 = vmatpush.msra.mxu2 %v124_v42  ;;  %v145_v61 = vld [vmem:[#allocation2 + $0x100] sm:$0xff]  ;;  %v146_v63 = vld [vmem:[#allocation2 + $0x108] sm:$0xff] }
  0x2c   :  { %210 = vmatpush.msra.mxu1 %v155_v41  ;;  %256 = vmatpush.msra.mxu3 %v156_v43  ;;  %v109_v0 = vld [vmem:[%s2360_s0] sm:$0xff]  ;;  %v1669_v1 = vld [vmem:[%s2360_s0 + $0x8] sm:$0xff]  ;;  %v312_v41 = vld [vmem:[%s2363_s3 + $0x18] sm:$0xff] }
  0x2d   :  { %188 = vmatpush.msra.mxu0 %v121_v44  ;;  %234 = vmatpush.msra.mxu2 %v122_v46  ;;  %v111_v2 = vmul.f32 %v109_v0, %v109_v0  ;;  %v112_v3 = vmul.f32 %v1669_v1, %v1669_v1  ;;  %v301_v30 = vld [vmem:[#allocation5] sm:$0x3] }
  0x2e   :  { %211 = vmatpush.msra.mxu1 %v153_v45  ;;  %257 = vmatpush.msra.mxu3 %v154_v47  ;;  %v303_v35 = vperm.slane %v301_v30, 0  ;;  %v309_v40 = vld [vmem:[%s2363_s3] sm:$0xff]  ;;  %v304_v45 = vperm.slane %v301_v30, 1 }
  0x2f   :  { %189 = vmatpush.msra.mxu0 %v119_v48  ;;  %235 = vmatpush.msra.mxu2 %v120_v50  ;;  %v311_v50 = vld [vmem:[%s2363_s3 + $0x10] sm:$0xff] }
  0x30   :  { %212 = vmatpush.msra.mxu1 %v151_v49  ;;  %258 = vmatpush.msra.mxu3 %v152_v51  ;;  %v310_v49 = vld [vmem:[%s2363_s3 + $0x8] sm:$0xff]  ;;  %s1589_s3 = smov 7  }
  0x31   :  { %190 = vmatpush.msra.mxu0 %v117_v52  ;;  %236 = vmatpush.msra.mxu2 %v118_v54  ;;  %v313_v51 = vld [vmem:[#allocation7] sm:$0xff] }
  0x32   :  { %213 = vmatpush.msra.mxu1 %v149_v53  ;;  %259 = vmatpush.msra.mxu3 %v150_v55  ;;  %v319_v55 = vld [vmem:[#allocation7 + $0x30] sm:$0xff] }
  0x33   :  { %191 = vmatpush.msra.mxu0 %v115_v56  ;;  %237 = vmatpush.msra.mxu2 %v116_v58 }
  0x34   :  { %214 = vmatpush.msra.mxu1 %v147_v57  ;;  %260 = vmatpush.msra.mxu3 %v148_v59  ;;  %v314_v57 = vld [vmem:[#allocation7 + $0x8] sm:$0xff] }
  0x35   :  { %192 = vmatpush.msra.mxu0 %v113_v60  ;;  %238 = vmatpush.msra.mxu2 %v114_v62 }
  0x36   :  { %215 = vmatpush.msra.mxu1 %v145_v61  ;;  %261 = vmatpush.msra.mxu3 %v146_v63 }
  0x37   :  { %193 = vmatmul.f32.vlgmr.msra.gmra.mxu0 %v109_v0  ;;  %216 = vmatmul.f32.vlgmr.msra.gmra.mxu1 %v1669_v1 }
  0x38   :  { %239 = vmatmul.f32.vlgmr.msra.gmra.mxu2 %v109_v0  ;;  %262 = vmatmul.f32.vlgmr.msra.gmra.mxu3 %v1669_v1 }
  0x3f   :  { %196 = vmatmul.f32.gmra.mxu0 %v111_v2  ;;  %219 = vmatmul.f32.gmra.mxu1 %v112_v3 }
  0x40   :  { %242 = vmatmul.f32.gmra.mxu2 %v111_v2  ;;  %265 = vmatmul.f32.gmra.mxu3 %v112_v3  ;;  %v315_v2 = vld [vmem:[#allocation7 + $0x10] sm:$0xff] }
  0xb4   :  { %v194_v4 = vpop.f32.mrf.mxu0  ;;  %v217_v5 = vpop.f32.mrf.mxu1 }
  0xb5   :  { %v218_v6 = vadd.f32 %v217_v5, %v194_v4 }
  0xb7   :  { %v269_v11 = vmul.f32 %v218_v6, %v218_v6  ;;  %v275_v33 = vsub.f32 %v109_v0, %v218_v6 }
  0xbb   :  { %v240_v7 = vpop.f32.mrf.mxu2  ;;  %v263_v8 = vpop.f32.mrf.mxu3 }
  0xbc   :  { %v197_v9 = vpop.f32.mrf.mxu0  ;;  %v220_v10 = vpop.f32.mrf.mxu1  ;;  %v264_v13 = vadd.f32 %v263_v8, %v240_v7 }
  0xbd   :  { %v221_v12 = vadd.f32 %v220_v10, %v197_v9 }
  0xbe   :  { %v270_v16 = vmul.f32 %v264_v13, %v264_v13  ;;  %v276_v44 = vsub.f32 %v1669_v1, %v264_v13 }
  0xbf   :  { %v271_v14 = vsub.f32 %v221_v12, %v269_v11 }
  0xc1   :  { %v273_v15 = vmax.f32 %v271_v14, 0.0 }
  0xc3   :  { %v277_v17 = vadd.f32 1e-06, %v273_v15  ;;  %v243_v18 = vpop.f32.mrf.mxu2  ;;  %v266_v19 = vpop.f32.mrf.mxu3 }
  0xc4   :  { %v267_v20 = vadd.f32 %v266_v19, %v243_v18 }
  0xc5   :  { %1362 = vrsqrt.f32 %v277_v17  ;;  %vm285_vm1 = vweird.f32 %v277_v17 }
  0xc6   :  { %v272_v21 = vsub.f32 %v267_v20, %v270_v16 }
  0xc8   :  { %v274_v22 = vmax.f32 %v272_v21, 0.0 }
  0xca   :  { %v278_v23 = vadd.f32 1e-06, %v274_v22 }
  0xcb   :  { %v1363_v24 = vpop.eup %1362 }
  0xcc   :  { %v280_v25 = vmul.f32 %v1363_v24, %v277_v17  ;;  %1364 = vrsqrt.f32 %v278_v23  ;;  %vm286_vm0 = vweird.f32 %v1363_v24  ;;  %vm295_vm3 = vweird.f32 %v278_v23 }
  0xcd   :  { %vm287_vm2 = vmor %vm285_vm1, %vm286_vm0 }
  0xce   :  { %v281_v26 = vmul.f32 %v1363_v24, %v280_v25 }
  0xd0   :  { %v282_v27 = vmul.f32 0.5, %v281_v26  ;;  %v320_v26 = vld [vmem:[#allocation7 + $0x38] sm:$0xff] }
  0xd2   :  { %v1365_v28 = vpop.eup %1364  ;;  %v283_v29 = vsub.f32 1.5, %v282_v27 }
  0xd3   :  { %v290_v31 = vmul.f32 %v1365_v28, %v278_v23  ;;  %vm296_vm4 = vweird.f32 %v1365_v28 }
  0xd4   :  { %v284_v32 = vmul.f32 %v1363_v24, %v283_v29  ;;  %vm297_vm6 = vmor %vm295_vm3, %vm296_vm4 }
  0xd5   :  { %v291_v34 = vmul.f32 %v1365_v28, %v290_v31 }
  0xd6   :  { %v288_v36 = vsel %vm287_vm2, %v1363_v24, %v284_v32 }
  0xd7   :  { %v292_v37 = vmul.f32 0.5, %v291_v34  ;;  %v299_v38 = vmul.f32 %v288_v36, %v275_v33 }
  0xd9   :  { %v307_v39 = vmul.f32 %v303_v35, %v299_v38  ;;  %v293_v42 = vsub.f32 1.5, %v292_v37 }
  0xdb   :  { %349 = vmatpush.msrb.mxu0 %v307_v39  ;;  %1344 = vmatpush.msrb.mxu2 %v307_v39  ;;  %v294_v43 = vmul.f32 %v1365_v28, %v293_v42 }
  0xdc   :  { %1334 = vmatmul.msk.f32.vlgmr.msrb.gmra.mxu0 %vm321_vm5, %v309_v40  ;;  %1337 = vmatmul.msk.f32.vlgmr.msrb.gmra.mxu2 %vm321_vm5, %v312_v41 }
  0xdd   :  { %v298_v46 = vsel %vm297_vm6, %v1365_v28, %v294_v43 }
  0xde   :  { %v300_v47 = vmul.f32 %v298_v46, %v276_v44 }
  0xe0   :  { %v308_v48 = vmul.f32 %v304_v45, %v300_v47 }
  0xe2   :  { %378 = vmatpush.msrb.mxu1 %v308_v48  ;;  %1345 = vmatpush.msrb.mxu3 %v308_v48 }
  0xe3   :  { %1338 = vmatmul.msk.f32.vlgmr.msrb.gmra.mxu1 %vm321_vm5, %v309_v40  ;;  %1341 = vmatmul.msk.f32.vlgmr.msrb.gmra.mxu3 %vm321_vm5, %v312_v41 }
  0xe4   :  { %1335 = vmatmul.msk.f32.gmra.mxu0 %vm321_vm5, %v310_v49 }
  0xeb   :  { %1339 = vmatmul.msk.f32.gmra.mxu1 %vm321_vm5, %v310_v49 }
  0xec   :  { %1336 = vmatmul.msk.f32.gmra.mxu0 %vm321_vm5, %v311_v50 }
  0xf3   :  { %1340 = vmatmul.msk.f32.gmra.mxu1 %vm321_vm5, %v311_v50 }
 0x159   :  { %v351_v52 = vpop.f32.mrf.mxu0 }
 0x15a   :  { %v1696_v53 = vadd.f32 %v351_v52, %v313_v51 }
 0x15c   :  { %v392_v54 = vand.u32 2147483647, %v1696_v53  ;;  %vm568_vm7 = vcmp.ge.f32.partialorder %v1696_v53, 0.0 }
 0x15e   :  { %v400_v56 = vmul.f32 0.70710677, %v392_v54 }
 0x15f   :  { %v360_v58 = vpop.f32.mrf.mxu2 }
 0x160   :  { %v408_v59 = vmul.f32 0.3275911, %v400_v56  ;;  %v1699_v60 = vadd.f32 %v360_v58, %v319_v55  ;;  %v380_v61 = vpop.f32.mrf.mxu1  ;;  %v528_v18 = vsub.f32 0.0, %v400_v56 }
 0x161   :  { %v1701_v62 = vadd.f32 %v380_v61, %v314_v57  ;;  %v354_v3 = vpop.f32.mrf.mxu0 }
 0x162   :  { %v416_v63 = vadd.f32 1.0, %v408_v59  ;;  %v398_v0 = vand.u32 2147483647, %v1699_v60  ;;  %v1707_v7 = vadd.f32 %v354_v3, %v315_v2  ;;  %v536_v28 = vmul.f32 %v528_v18, %v400_v56  ;;  %v316_v2 = vld [vmem:[#allocation7 + $0x18] sm:$0xff] }
 0x163   :  { %v393_v1 = vand.u32 2147483647, %v1701_v62  ;;  %vm574_vm8 = vcmp.ge.f32.partialorder %v1699_v60, 0.0  ;;  %vm569_vm9 = vcmp.ge.f32.partialorder %v1701_v62, 0.0 }
 0x164   :  { %1366 = vrcp.f32 %v416_v63  ;;  %v406_v4 = vmul.f32 0.70710677, %v398_v0  ;;  %v394_v12 = vand.u32 2147483647, %v1707_v7  ;;  %v544_v37 = vmul.f32 1.442695, %v536_v28 }
 0x165   :  { %v1705_v5 = vmul.f32 0.70710677, %v393_v1  ;;  %vm570_vm10 = vcmp.ge.f32.partialorder %v1707_v7, 0.0 }
 0x166   :  { %v414_v6 = vmul.f32 0.3275911, %v406_v4  ;;  %v1711_v15 = vmul.f32 0.70710677, %v394_v12  ;;  %v389_v27 = vpop.f32.mrf.mxu3  ;;  %v534_v38 = vsub.f32 0.0, %v406_v4 }
 0x167   :  { %v409_v8 = vmul.f32 0.3275911, %v1705_v5  ;;  %v1716_v34 = vadd.f32 %v389_v27, %v320_v26 }
 0x168   :  { %v422_v9 = vadd.f32 1.0, %v414_v6  ;;  %v410_v23 = vmul.f32 0.3275911, %v1711_v15  ;;  %v542_v46 = vmul.f32 %v534_v38, %v406_v4  ;;  %v383_v3 = vpop.f32.mrf.mxu1 }
 0x169   :  { %v417_v10 = vadd.f32 1.0, %v409_v8  ;;  %v399_v42 = vand.u32 2147483647, %v1716_v34  ;;  %v529_v8 = vsub.f32 0.0, %v1705_v5  ;;  %vm575_vm11 = vcmp.ge.f32.partialorder %v1716_v34, 0.0 }
 0x16a   :  { %v1367_v11 = vpop.eup %1366  ;;  %1368 = vrcp.f32 %v422_v9  ;;  %v418_v33 = vadd.f32 1.0, %v410_v23  ;;  %v556_v55 = vmul.f32 1.442695, %v542_v46  ;;  %v357_v46 = vpop.f32.mrf.mxu0 }
 0x16b   :  { %v432_v13 = vmul.f32 %v1367_v11, %v416_v63  ;;  %1370 = vrcp.f32 %v417_v10  ;;  %v1720_v49 = vmul.f32 0.70710677, %v399_v42 }
 0x16c   :  { %1372 = vrcp.f32 %v418_v33 }
 0x16d   :  { %v440_v14 = vsub.f32 2.0, %v432_v13  ;;  %1374 = vpow2.f32 %v544_v37  ;;  %v415_v59 = vmul.f32 0.3275911, %v1720_v49 }
 0x16e   :  { %1376 = vpow2.f32 %v556_v55 }
 0x16f   :  { %v448_v16 = vmul.f32 %v1367_v11, %v440_v14 }
 0x170   :  { %v1369_v17 = vpop.eup %1368 }
 0x171   :  { %v1371_v19 = vpop.eup %1370  ;;  %v456_v20 = vmul.f32 1.0614054, %v448_v16  ;;  %v438_v21 = vmul.f32 %v1369_v17, %v422_v9  ;;  %v423_v9 = vadd.f32 1.0, %v415_v59 }
 0x172   :  { %v433_v22 = vmul.f32 %v1371_v19, %v417_v10  ;;  %v1373_v54 = vpop.eup %1372  ;;  %v1725_v10 = vadd.f32 %v383_v3, %v316_v2 }
 0x173   :  { %v464_v24 = vadd.f32 -1.4531521, %v456_v20  ;;  %v446_v25 = vsub.f32 2.0, %v438_v21  ;;  %v1375_v58 = vpop.eup %1374  ;;  %v434_v1 = vmul.f32 %v1373_v54, %v418_v33  ;;  %1378 = vrcp.f32 %v423_v9 }
 0x174   :  { %v441_v29 = vsub.f32 2.0, %v433_v22  ;;  %v395_v20 = vand.u32 2147483647, %v1725_v10  ;;  %vm571_vm12 = vcmp.ge.f32.partialorder %v1725_v10, 0.0 }
 0x175   :  { %v472_v30 = vmul.f32 %v464_v24, %v448_v16  ;;  %v454_v31 = vmul.f32 %v1369_v17, %v446_v25  ;;  %v442_v14 = vsub.f32 2.0, %v434_v1  ;;  %v1377_v17 = vpop.eup %1376 }
 0x176   :  { %v1714_v32 = vmul.f32 %v1371_v19, %v441_v29  ;;  %v537_v19 = vmul.f32 %v529_v8, %v1705_v5  ;;  %v1742_v5 = vmul.f32 0.70710677, %v395_v20 }
 0x177   :  { %v480_v35 = vadd.f32 1.4214138, %v472_v30  ;;  %v462_v36 = vmul.f32 1.0614054, %v454_v31  ;;  %v1734_v23 = vmul.f32 %v1373_v54, %v442_v14 }
 0x178   :  { %v457_v39 = vmul.f32 1.0614054, %v1714_v32  ;;  %v411_v28 = vmul.f32 0.3275911, %v1742_v5 }
 0x179   :  { %v488_v40 = vmul.f32 %v480_v35, %v448_v16  ;;  %v470_v41 = vadd.f32 -1.4531521, %v462_v36  ;;  %v458_v26 = vmul.f32 1.0614054, %v1734_v23  ;;  %v1379_v27 = vpop.eup %1378 }
 0x17a   :  { %v465_v45 = vadd.f32 -1.4531521, %v457_v39  ;;  %v439_v33 = vmul.f32 %v1379_v27, %v423_v9  ;;  %v419_v35 = vadd.f32 1.0, %v411_v28  ;;  %v535_v9 = vsub.f32 0.0, %v1720_v49 }
 0x17b   :  { %v496_v43 = vadd.f32 -0.28449672, %v488_v40  ;;  %v478_v44 = vmul.f32 %v470_v41, %v454_v31 }
 0x17c   :  { %v473_v52 = vmul.f32 %v465_v45, %v1714_v32  ;;  %v447_v39 = vsub.f32 2.0, %v439_v33  ;;  %v317_v45 = vld [vmem:[#allocation7 + $0x20] sm:$0xff]  ;;  %v531_v33 = vsub.f32 0.0, %v1742_v5 }
 0x17d   :  { %v504_v47 = vmul.f32 %v496_v43, %v448_v16  ;;  %v486_v48 = vadd.f32 1.4214138, %v478_v44 }
 0x17e   :  { %v481_v0 = vadd.f32 1.4214138, %v473_v52  ;;  %v1759_v44 = vmul.f32 %v1379_v27, %v447_v39 }
 0x17f   :  { %v512_v50 = vadd.f32 0.2548296, %v504_v47  ;;  %v494_v51 = vmul.f32 %v486_v48, %v454_v31 }
 0x180   :  { %v489_v13 = vmul.f32 %v481_v0, %v1714_v32 }
 0x181   :  { %v520_v56 = vmul.f32 %v512_v50, %v448_v16  ;;  %v502_v57 = vadd.f32 -0.28449672, %v494_v51  ;;  %v463_v50 = vmul.f32 1.0614054, %v1759_v44 }
 0x182   :  { %v497_v22 = vadd.f32 -0.28449672, %v489_v13 }
 0x183   :  { %v560_v61 = vmul.f32 %v1375_v58, %v520_v56  ;;  %v510_v63 = vmul.f32 %v502_v57, %v454_v31  ;;  %v471_v57 = vadd.f32 -1.4531521, %v463_v50 }
 0x184   :  { %v505_v25 = vmul.f32 %v497_v22, %v1714_v32  ;;  %v386_v22 = vpop.f32.mrf.mxu1 }
 0x185   :  { %v576_v4 = vmul.f32 0.5, %v560_v61  ;;  %v518_v6 = vadd.f32 0.2548296, %v510_v63  ;;  %v479_v0 = vmul.f32 %v471_v57, %v1759_v44 }
 0x186   :  { %v513_v30 = vadd.f32 0.2548296, %v505_v25 }
 0x187   :  { %v584_v11 = vsub.f32 1.0, %v576_v4  ;;  %v526_v12 = vmul.f32 %v518_v6, %v454_v31  ;;  %v466_v31 = vadd.f32 -1.4531521, %v458_v26  ;;  %v487_v6 = vadd.f32 1.4214138, %v479_v0 }
 0x188   :  { %v521_v37 = vmul.f32 %v513_v30, %v1714_v32  ;;  %v1768_v32 = vadd.f32 %v357_v46, %v317_v45 }
 0x189   :  { %v592_v16 = vsel %vm568_vm7, %v584_v11, %v576_v4  ;;  %v566_v21 = vmul.f32 %v1377_v17, %v526_v12  ;;  %v474_v38 = vmul.f32 %v466_v31, %v1734_v23  ;;  %v495_v12 = vmul.f32 %v487_v6, %v1759_v44 }
 0x18a   :  { %v1730_v18 = vmul.f32 %v592_v16, %v1696_v53  ;;  %v546_v53 = vmul.f32 1.442695, %v537_v19  ;;  %v396_v54 = vand.u32 2147483647, %v1768_v32  ;;  %v543_v16 = vmul.f32 %v535_v9, %v1720_v49 }
 0x18b   :  { %v582_v24 = vmul.f32 0.5, %v566_v21  ;;  %v482_v43 = vadd.f32 1.4214138, %v474_v38  ;;  %v503_v19 = vadd.f32 -0.28449672, %v495_v12  ;;  %v318_v21 = vld [vmem:[#allocation7 + $0x28] sm:$0xff] }
 0x18c   :  { %742 = vrot.lane.b32.xlu1 %v1730_v18, %s1589_s3  ;;  %692 = vrot.lane.b32.xlu2 %v1730_v18, %s1590_s21  ;;  %1380 = vpow2.f32 %v546_v53  ;;  %v1781_v61 = vmul.f32 0.70710677, %v396_v54  ;;  %v1808_v53 = vadd.f32 %v386_v22, %v318_v21  ;;  %vm572_vm13 = vcmp.ge.f32.partialorder %v1768_v32, 0.0 }
 0x18d   :  { %641 = vrot.lane.b32.xlu0 %v1730_v18, %s1591_s2  ;;  %v590_v29 = vsub.f32 1.0, %v582_v24  ;;  %1382 = vrcp.f32 %v419_v35  ;;  %v490_v48 = vmul.f32 %v482_v43, %v1734_v23 }
 0x18e   :  { %v412_v3 = vmul.f32 0.3275911, %v1781_v61  ;;  %v397_v27 = vand.u32 2147483647, %v1808_v53  ;;  %vm573_vm15 = vcmp.ge.f32.partialorder %v1808_v53, 0.0 }
 0x18f   :  { %v598_v36 = vsel %vm574_vm8, %v590_v29, %v582_v24  ;;  %v498_v56 = vadd.f32 -0.28449672, %v490_v48  ;;  %v511_v24 = vmul.f32 %v503_v19, %v1759_v44 }
 0x190   :  { %v1757_v41 = vmul.f32 %v598_v36, %v1699_v60  ;;  %v530_v60 = vsub.f32 0.0, %v1711_v15 }
 0x191   :  { %v506_v63 = vmul.f32 %v498_v56, %v1734_v23  ;;  %v519_v29 = vadd.f32 0.2548296, %v511_v24 }
 0x192   :  { %v1381_v40 = vpop.eup %1380  ;;  %v538_v52 = vmul.f32 %v530_v60, %v1711_v15 }
 0x193   :  { %v561_v42 = vmul.f32 %v1381_v40, %v521_v37  ;;  %v1383_v51 = vpop.eup %1382  ;;  %v514_v4 = vadd.f32 0.2548296, %v506_v63  ;;  %v527_v37 = vmul.f32 %v519_v29, %v1759_v44 }
 0x194   :  { %892 = vrot.lane.b32.xlu1 %v1730_v18, %s1592_s22  ;;  %842 = vrot.lane.b32.xlu2 %v1730_v18, %s1593_s23  ;;  %v435_v58 = vmul.f32 %v1383_v51, %v419_v35  ;;  %v548_v59 = vmul.f32 1.442695, %v538_v52  ;;  %v1821_v35 = vmul.f32 0.70710677, %v397_v27 }
 0x195   :  { %792 = vrot.lane.b32.xlu0 %v1730_v18, %s1594_s24  ;;  %v577_v47 = vmul.f32 0.5, %v561_v42  ;;  %v522_v11 = vmul.f32 %v514_v4, %v1734_v23  ;;  %v558_v23 = vmul.f32 1.442695, %v543_v16  ;;  %v539_v42 = vmul.f32 %v531_v33, %v1742_v5 }
 0x196   :  { %v443_v1 = vsub.f32 2.0, %v435_v58  ;;  %1384 = vpow2.f32 %v548_v59  ;;  %v413_v45 = vmul.f32 0.3275911, %v1821_v35  ;;  %v533_v24 = vsub.f32 0.0, %v1821_v35 }
 0x197   :  { %v585_v55 = vsub.f32 1.0, %v577_v47  ;;  %v550_v44 = vmul.f32 1.442695, %v539_v42 }
 0x198   :  { %v1789_v8 = vmul.f32 %v1383_v51, %v443_v1  ;;  %v421_v48 = vadd.f32 1.0, %v413_v45 }
 0x199   :  { %v593_v15 = vsel %vm569_vm9, %v585_v55, %v577_v47 }
 0x19a   :  { %v1786_v2 = vmul.f32 %v593_v15, %v1701_v62  ;;  %v420_v62 = vadd.f32 1.0, %v412_v3  ;;  %v459_v13 = vmul.f32 1.0614054, %v1789_v8  ;;  %v532_v3 = vsub.f32 0.0, %v1781_v61 }
 0x19c   :  { %942 = vrot.lane.b32.xlu1 %v1730_v18, %s1595_s25  ;;  %698 = vrot.lane.b32.xlu2 %v1757_v41, %s1590_s21  ;;  %v1385_v14 = vpop.eup %1384  ;;  %1386 = vrcp.f32 %v420_v62  ;;  %v467_v20 = vadd.f32 -1.4531521, %v459_v13 }
 0x19d   :  { %647 = vrot.lane.b32.xlu0 %v1757_v41, %s1591_s2  ;;  %v562_v17 = vmul.f32 %v1385_v14, %v522_v11  ;;  %1388 = vpow2.f32 %v558_v23 }
 0x19e   :  { %v475_v25 = vmul.f32 %v467_v20, %v1789_v8  ;;  %1390 = vpow2.f32 %v550_v44 }
 0x19f   :  { %v578_v49 = vmul.f32 0.5, %v562_v17  ;;  %1392 = vrcp.f32 %v421_v48 }
 0x1a0   :  { %v483_v30 = vadd.f32 1.4214138, %v475_v25 }
 0x1a1   :  { %v586_v28 = vsub.f32 1.0, %v578_v49 }
 0x1a2   :  { %v1387_v26 = vpop.eup %1386  ;;  %v491_v38 = vmul.f32 %v483_v30, %v1789_v8 }
 0x1a3   :  { %v436_v31 = vmul.f32 %v1387_v26, %v420_v62  ;;  %v594_v36 = vsel %vm570_vm10, %v586_v28, %v578_v49  ;;  %v1389_v40 = vpop.eup %1388  ;;  %v541_v28 = vmul.f32 %v533_v24, %v1821_v35 }
 0x1a4   :  { %748 = vrot.lane.b32.xlu1 %v1757_v41, %s1589_s3  ;;  %848 = vrot.lane.b32.xlu2 %v1757_v41, %s1593_s23  ;;  %v1827_v43 = vmul.f32 %v594_v36, %v1707_v7  ;;  %v567_v46 = vmul.f32 %v1389_v40, %v527_v37  ;;  %v499_v60 = vadd.f32 -0.28449672, %v491_v38  ;;  %v1391_v55 = vpop.eup %1390 }
 0x1a5   :  { %798 = vrot.lane.b32.xlu0 %v1757_v41, %s1594_s24  ;;  %v444_v39 = vsub.f32 2.0, %v436_v31  ;;  %v1393_v59 = vpop.eup %1392  ;;  %v554_v31 = vmul.f32 1.442695, %v541_v28  ;;  %v769_v28 = vld [vmem:[#allocation8 + $0x88] sm:$0xff] }
 0x1a6   :  { %v583_v5 = vmul.f32 0.5, %v567_v46  ;;  %v507_v7 = vmul.f32 %v499_v60, %v1789_v8  ;;  %v437_v1 = vmul.f32 %v1393_v59, %v421_v48 }
 0x1a7   :  { %v452_v47 = vmul.f32 %v1387_v26, %v444_v39  ;;  %v657_v39 = vlaneseq }
 0x1a8   :  { %v591_v51 = vsub.f32 1.0, %v583_v5  ;;  %v515_v52 = vadd.f32 0.2548296, %v507_v7 }
 0x1a9   :  { %v460_v50 = vmul.f32 1.0614054, %v452_v47 }
 0x1aa   :  { %v599_v56 = vsel %vm575_vm11, %v591_v51, %v583_v5  ;;  %v523_v57 = vmul.f32 %v515_v52, %v1789_v8  ;;  %v445_v8 = vsub.f32 2.0, %v437_v1 }
 0x1ab   :  { %v468_v54 = vadd.f32 -1.4531521, %v460_v50  ;;  %v1846_v15 = vmul.f32 %v599_v56, %v1716_v34  ;;  %v540_v34 = vmul.f32 %v532_v3, %v1781_v61  ;;  %v609_v3 = vld [vmem:[#allocation8 + $0x100] sm:$0xff] }
 0x1ac   :  { %649 = vrot.lane.b32.xlu1 %v1786_v2, %s1591_s2  ;;  %750 = vrot.lane.b32.xlu2 %v1786_v2, %s1589_s3  ;;  %v563_v63 = vmul.f32 %v1391_v55, %v523_v57  ;;  %v453_v11 = vmul.f32 %v1393_v59, %v445_v8  ;;  %v625_v8 = vld [vmem:[#allocation10] sm:$0xff] }
 0x1ad   :  { %700 = vrot.lane.b32.xlu0 %v1786_v2, %s1590_s21  ;;  %v476_v58 = vmul.f32 %v468_v54, %v452_v47  ;;  %v552_v12 = vmul.f32 1.442695, %v540_v34  ;;  %v617_v34 = vmul.f32 %v609_v3, %v1730_v18  ;;  %v869_v3 = vld [vmem:[#allocation8 + $0x148] sm:$0xff] }
 0x1ae   :  { %v579_v4 = vmul.f32 0.5, %v563_v63  ;;  %v461_v16 = vmul.f32 1.0614054, %v453_v11 }
 0x1af   :  { %v484_v0 = vadd.f32 1.4214138, %v476_v58  ;;  %1394 = vpow2.f32 %v552_v12  ;;  %v633_v24 = vadd.f32 %v625_v8, %v617_v34 }
 0x1b0   :  { %v587_v9 = vsub.f32 1.0, %v579_v4  ;;  %v469_v19 = vadd.f32 -1.4531521, %v461_v16  ;;  %1396 = vpow2.f32 %v554_v31 }
 0x1b1   :  { %v492_v6 = vmul.f32 %v484_v0, %v452_v47 }
 0x1b2   :  { %v595_v13 = vsel %vm571_vm12, %v587_v9, %v579_v4  ;;  %v477_v22 = vmul.f32 %v469_v19, %v453_v11  ;;  %v610_v4 = vld [vmem:[#allocation8 + $0x108] sm:$0xff] }
 0x1b3   :  { %v500_v62 = vadd.f32 -0.28449672, %v492_v6  ;;  %v1864_v61 = vmul.f32 %v595_v13, %v1725_v10  ;;  %v618_v6 = vmul.f32 %v610_v4, %v1786_v2  ;;  %v626_v9 = vld [vmem:[#allocation10 + $0x8] sm:$0xff] }
 0x1b4   :  { %898 = vrot.lane.b32.xlu1 %v1757_v41, %s1592_s22  ;;  %998 = vrot.lane.b32.xlu2 %v1757_v41, %s1596_s26  ;;  %v485_v10 = vadd.f32 1.4214138, %v477_v22  ;;  %v719_v22 = vld [vmem:[#allocation8 + $0x48] sm:$0xff] }
 0x1b5   :  { %948 = vrot.lane.b32.xlu0 %v1757_v41, %s1595_s25  ;;  %v508_v14 = vmul.f32 %v500_v62, %v452_v47  ;;  %v1395_v23 = vpop.eup %1394  ;;  %v668_v62 = vld [vmem:[#allocation8] sm:$0xff] }
 0x1b6   :  { %v493_v27 = vmul.f32 %v485_v10, %v453_v11  ;;  %v1397_v60 = vpop.eup %1396  ;;  %v634_v10 = vadd.f32 %v626_v9, %v618_v6 }
 0x1b7   :  { %v516_v17 = vadd.f32 0.2548296, %v508_v14 }
 0x1b8   :  { %v501_v30 = vadd.f32 -0.28449672, %v493_v27 }
 0x1b9   :  { %v524_v21 = vmul.f32 %v516_v17, %v452_v47 }
 0x1ba   :  { %v509_v37 = vmul.f32 %v501_v30, %v453_v11 }
 0x1bb   :  { %v564_v49 = vmul.f32 %v1395_v23, %v524_v21  ;;  %v718_v21 = vld [vmem:[#allocation8 + $0x40] sm:$0xff] }
 0x1bc   :  { %800 = vrot.lane.b32.xlu1 %v1786_v2, %s1594_s24  ;;  %900 = vrot.lane.b32.xlu2 %v1786_v2, %s1592_s22  ;;  %v517_v38 = vadd.f32 0.2548296, %v509_v37 }
 0x1bd   :  { %850 = vrot.lane.b32.xlu0 %v1786_v2, %s1593_s23  ;;  %v580_v26 = vmul.f32 0.5, %v564_v49  ;;  %v768_v49 = vld [vmem:[#allocation8 + $0x80] sm:$0xff] }
 0x1be   :  { %v525_v45 = vmul.f32 %v517_v38, %v453_v11  ;;  %v669_v11 = vld [vmem:[#allocation8 + $0x8] sm:$0xff] }
 0x1bf   :  { %v588_v29 = vsub.f32 1.0, %v580_v26 }
 0x1c0   :  { %v565_v47 = vmul.f32 %v1397_v60, %v525_v45 }
 0x1c1   :  { %v596_v36 = vsel %vm572_vm13, %v588_v29, %v580_v26 }
 0x1c2   :  { %v1894_v35 = vmul.f32 %v596_v36, %v1768_v32  ;;  %v1904_v32 = vand.u32 127, %v657_v39  ;;  %v581_v5 = vmul.f32 0.5, %v565_v47 }
 0x1c4   :  { %744 = vrot.lane.b32.xlu1 %v1827_v43, %s1589_s3  ;;  %950 = vrot.lane.b32.xlu2 %v1786_v2, %s1595_s25  ;;  %vm758_vm14 = vcmp.lt.s32.totalorder %v1904_v32, 7  ;;  %v589_v52 = vsub.f32 1.0, %v581_v5  ;;  %vm908_vm0 = vcmp.lt.s32.totalorder %v1904_v32, 121  ;;  %vm659_vm1 = vcmp.lt.s32.totalorder %v1904_v32, 9 }
 0x1c5   :  { %643 = vrot.lane.b32.xlu0 %v1827_v43, %s1591_s2  ;;  %vm958_vm2 = vcmp.lt.s32.totalorder %v1904_v32, 120  ;;  %vm708_vm3 = vcmp.lt.s32.totalorder %v1904_v32, 8  ;;  %vm808_vm4 = vcmp.lt.s32.totalorder %v1904_v32, 1  ;;  %vm858_vm5 = vcmp.lt.s32.totalorder %v1904_v32, 127 }
 0x1c6   :  { %v597_v56 = vsel %vm573_vm15, %v589_v52, %v581_v5  ;;  %v818_v5 = vld [vmem:[#allocation8 + $0xc0] sm:$0xff]  ;;  %vm1008_vm6 = vcmp.lt.s32.totalorder %v1904_v32, 119  ;;  %vm1269_vm15 = vcmask 261120  }
 0x1c7   :  { %v1931_v58 = vmul.f32 %v597_v56, %v1808_v53 }
 0x1cc   :  { %894 = vrot.lane.b32.xlu1 %v1827_v43, %s1592_s22  ;;  %694 = vrot.lane.b32.xlu2 %v1827_v43, %s1590_s21 }
 0x1cd   :  { %794 = vrot.lane.b32.xlu0 %v1827_v43, %s1594_s24 }
 0x1d4   :  { %806 = vrot.lane.b32.xlu1 %v1846_v15, %s1594_s24  ;;  %844 = vrot.lane.b32.xlu2 %v1827_v43, %s1593_s23 }
 0x1d5   :  { %944 = vrot.lane.b32.xlu0 %v1827_v43, %s1595_s25 }
 0x1dc   :  { %956 = vrot.lane.b32.xlu1 %v1846_v15, %s1595_s25  ;;  %706 = vrot.lane.b32.xlu2 %v1846_v15, %s1590_s21 }
 0x1dd   :  { %994 = vrot.lane.b32.xlu0 %v1827_v43, %s1596_s26 }
 0x1e4   :  { %651 = vrot.lane.b32.xlu1 %v1864_v61, %s1591_s2  ;;  %756 = vrot.lane.b32.xlu2 %v1846_v15, %s1589_s3 }
 0x1e5   :  { %655 = vrot.lane.b32.xlu0 %v1846_v15, %s1591_s2 }
 0x1e6   :  { %v1872_v20 = vpop.permute.xlu2 %692 }
 0x1ec   :  { %802 = vrot.lane.b32.xlu1 %v1864_v61, %s1594_s24  ;;  %906 = vrot.lane.b32.xlu2 %v1846_v15, %s1592_s22 }
 0x1ed   :  { %856 = vrot.lane.b32.xlu0 %v1846_v15, %s1593_s23 }
 0x1ee   :  { %v1881_v25 = vpop.permute.xlu2 %842 }
 0x1f4   :  { %952 = vrot.lane.b32.xlu1 %v1864_v61, %s1595_s25  ;;  %752 = vrot.lane.b32.xlu2 %v1864_v61, %s1589_s3 }
 0x1f5   :  { %1006 = vrot.lane.b32.xlu0 %v1846_v15, %s1596_s26 }
 0x1f6   :  { %v1891_v33 = vpop.permute.xlu2 %698 }
 0x1fc   :  { %645 = vrot.lane.b32.xlu1 %v1894_v35, %s1591_s2  ;;  %902 = vrot.lane.b32.xlu2 %v1864_v61, %s1592_s22 }
 0x1fd   :  { %702 = vrot.lane.b32.xlu0 %v1864_v61, %s1590_s21 }
 0x1fe   :  { %v743_v40 = vpop.permute.xlu1 %742  ;;  %v1902_v42 = vpop.permute.xlu2 %848 }
 0x1ff   :  { %v642_v46 = vpop.permute.xlu0 %641 }
 0x204   :  { %746 = vrot.lane.b32.xlu1 %v1894_v35, %s1589_s3  ;;  %696 = vrot.lane.b32.xlu2 %v1894_v35, %s1590_s21 }
 0x205   :  { %852 = vrot.lane.b32.xlu0 %v1864_v61, %s1593_s23 }
 0x206   :  { %v893_v44 = vpop.permute.xlu1 %892  ;;  %v751_v48 = vpop.permute.xlu2 %750 }
 0x207   :  { %v759_v7 = vsel %vm758_vm14, %v743_v40, %v751_v48  ;;  %v763_v50 = vsel %vm758_vm14, %v751_v48, %v743_v40  ;;  %v1917_v51 = vpop.permute.xlu0 %792 }
 0x208   :  { %v776_v39 = vmul.f32 %v768_v49, %v763_v50  ;;  %v777_v40 = vmul.f32 %v769_v28, %v759_v7  ;;  %v819_v7 = vld [vmem:[#allocation8 + $0xc8] sm:$0xff] }
 0x20c   :  { %896 = vrot.lane.b32.xlu1 %v1894_v35, %s1592_s22  ;;  %846 = vrot.lane.b32.xlu2 %v1894_v35, %s1593_s23 }
 0x20d   :  { %796 = vrot.lane.b32.xlu0 %v1894_v35, %s1594_s24 }
 0x20e   :  { %v943_v54 = vpop.permute.xlu1 %942  ;;  %v1926_v55 = vpop.permute.xlu2 %998 }
 0x20f   :  { %v1928_v57 = vpop.permute.xlu0 %647 }
 0x214   :  { %653 = vrot.lane.b32.xlu1 %v1931_v58, %s1591_s2  ;;  %996 = vrot.lane.b32.xlu2 %v1894_v35, %s1596_s26 }
 0x215   :  { %946 = vrot.lane.b32.xlu0 %v1894_v35, %s1595_s25 }
 0x216   :  { %v1940_v59 = vpop.permute.xlu1 %748  ;;  %v901_v63 = vpop.permute.xlu2 %900 }
 0x217   :  { %v1944_v0 = vsel %vm908_vm0, %v893_v44, %v901_v63  ;;  %v1948_v53 = vsel %vm908_vm0, %v901_v63, %v893_v44  ;;  %v1950_v1 = vpop.permute.xlu0 %798  ;;  %v868_v63 = vld [vmem:[#allocation8 + $0x140] sm:$0xff] }
 0x21c   :  { %804 = vrot.lane.b32.xlu1 %v1931_v58, %s1594_s24  ;;  %754 = vrot.lane.b32.xlu2 %v1931_v58, %s1589_s3 }
 0x21d   :  { %704 = vrot.lane.b32.xlu0 %v1931_v58, %s1590_s21 }
 0x21e   :  { %v650_v12 = vpop.permute.xlu1 %649  ;;  %v951_v13 = vpop.permute.xlu2 %950 }
 0x21f   :  { %v660_v14 = vsel %vm659_vm1, %v642_v46, %v650_v12  ;;  %v664_v16 = vsel %vm659_vm1, %v650_v12, %v642_v46  ;;  %v959_v17 = vsel %vm958_vm2, %v943_v54, %v951_v13  ;;  %v963_v19 = vsel %vm958_vm2, %v951_v13, %v943_v54  ;;  %v701_v23 = vpop.permute.xlu0 %700 }
 0x220   :  { %v676_v26 = vmul.f32 %v668_v62, %v664_v16  ;;  %v677_v27 = vmul.f32 %v669_v11, %v660_v14  ;;  %v709_v29 = vsel %vm708_vm3, %v1872_v20, %v701_v23  ;;  %v713_v30 = vsel %vm708_vm3, %v701_v23, %v1872_v20  ;;  %v918_v62 = vld [vmem:[#allocation8 + $0x180] sm:$0xff]  ;;  %v919_v11 = vld [vmem:[#allocation8 + $0x188] sm:$0xff] }
 0x221   :  { %v726_v37 = vmul.f32 %v718_v21, %v713_v30  ;;  %v727_v38 = vmul.f32 %v719_v22, %v709_v29  ;;  %v969_v21 = vld [vmem:[#allocation8 + $0x1c8] sm:$0xff]  ;;  %v926_v22 = vmul.f32 %v918_v62, %v1944_v0  ;;  %v927_v23 = vmul.f32 %v919_v11, %v1948_v53 }
 0x222   :  { %v684_v31 = vadd.f32 %v676_v26, %v633_v24  ;;  %v685_v36 = vadd.f32 %v677_v27, %v634_v10  ;;  %v977_v26 = vmul.f32 %v969_v21, %v963_v19 }
 0x224   :  { %v734_v45 = vadd.f32 %v726_v37, %v684_v31  ;;  %v735_v46 = vadd.f32 %v727_v38, %v685_v36  ;;  %954 = vrot.lane.b32.xlu1 %v1931_v58, %s1595_s25  ;;  %904 = vrot.lane.b32.xlu2 %v1931_v58, %s1592_s22 }
 0x225   :  { %854 = vrot.lane.b32.xlu0 %v1931_v58, %s1593_s23 }
 0x226   :  { %v1983_v60 = vpop.permute.xlu1 %898  ;;  %v1985_v20 = vpop.permute.xlu2 %694  ;;  %v784_v47 = vadd.f32 %v776_v39, %v734_v45  ;;  %v785_v44 = vadd.f32 %v777_v40, %v735_v46  ;;  %v615_v45 = vld [vmem:[#allocation8 + $0x130] sm:$0xff]  ;;  %v616_v46 = vld [vmem:[#allocation8 + $0x138] sm:$0xff] }
 0x227   :  { %v1987_v48 = vpop.permute.xlu0 %948 }
 0x22c   :  { %1002 = vrot.lane.b32.xlu1 %v1864_v61, %s1596_s26  ;;  %992 = vrot.lane.b32.xlu2 %v1730_v18, %s1596_s26 }
 0x22d   :  { %1004 = vrot.lane.b32.xlu0 %v1931_v58, %s1596_s26 }
 0x22e   :  { %v801_v50 = vpop.permute.xlu1 %800  ;;  %v1997_v52 = vpop.permute.xlu2 %844 }
 0x22f   :  { %v809_v54 = vsel %vm808_vm4, %v1917_v51, %v801_v50  ;;  %v813_v56 = vsel %vm808_vm4, %v801_v50, %v1917_v51  ;;  %v851_v4 = vpop.permute.xlu0 %850  ;;  %v968_v51 = vld [vmem:[#allocation8 + $0x1c0] sm:$0xff]  ;;  %v631_v50 = vld [vmem:[#allocation10 + $0x30] sm:$0xff] }
 0x230   :  { %v826_v6 = vmul.f32 %v818_v5, %v813_v56  ;;  %v827_v8 = vmul.f32 %v819_v7, %v809_v54  ;;  %v859_v34 = vsel %vm858_vm5, %v1881_v25, %v851_v4  ;;  %v863_v9 = vsel %vm858_vm5, %v851_v4, %v1881_v25  ;;  %v632_v54 = vld [vmem:[#allocation10 + $0x38] sm:$0xff]  ;;  %v674_v56 = vld [vmem:[#allocation8 + $0x30] sm:$0xff] }
 0x231   :  { %v876_v14 = vmul.f32 %v868_v63, %v859_v34  ;;  %v877_v16 = vmul.f32 %v869_v3, %v863_v9  ;;  %v976_v24 = vmul.f32 %v968_v51, %v959_v17  ;;  %v623_v5 = vmul.f32 %v615_v45, %v1757_v41  ;;  %v675_v63 = vld [vmem:[#allocation8 + $0x38] sm:$0xff]  ;;  %v724_v4 = vld [vmem:[#allocation8 + $0x70] sm:$0xff] }
 0x232   :  { %v834_v12 = vadd.f32 %v826_v6, %v784_v47  ;;  %v835_v13 = vadd.f32 %v827_v8, %v785_v44  ;;  %v624_v7 = vmul.f32 %v616_v46, %v1846_v15  ;;  %v725_v6 = vld [vmem:[#allocation8 + $0x78] sm:$0xff] }
 0x233   :  { %v639_v11 = vadd.f32 %v631_v50, %v623_v5  ;;  %v775_v51 = vld [vmem:[#allocation8 + $0xb8] sm:$0xff] }
 0x234   :  { %v884_v49 = vadd.f32 %v876_v14, %v834_v12  ;;  %v885_v10 = vadd.f32 %v877_v16, %v835_v13  ;;  %v640_v12 = vadd.f32 %v632_v54, %v624_v7  ;;  %v774_v16 = vld [vmem:[#allocation8 + $0xb0] sm:$0xff] }
 0x235   :  { %1000 = vrot.lane.b32.xlu0 %v1786_v2, %s1596_s26 }
 0x236   :  { %v934_v25 = vadd.f32 %v926_v22, %v884_v49  ;;  %v935_v27 = vadd.f32 %v927_v23, %v885_v10  ;;  %v2015_v28 = vpop.permute.xlu1 %744  ;;  %v707_v30 = vpop.permute.xlu2 %706 }
 0x237   :  { %v2017_v29 = vpop.permute.xlu0 %643  ;;  %v712_v8 = vsel %vm708_vm3, %v1891_v33, %v707_v30  ;;  %v716_v34 = vsel %vm708_vm3, %v707_v30, %v1891_v33 }
 0x238   :  { %v2019_v31 = vadd.f32 %v977_v26, %v935_v27  ;;  %v2021_v36 = vadd.f32 %v976_v24, %v934_v25  ;;  %v732_v22 = vmul.f32 %v724_v4, %v716_v34  ;;  %v733_v23 = vmul.f32 %v725_v6, %v712_v8  ;;  %v824_v24 = vld [vmem:[#allocation8 + $0xf0] sm:$0xff]  ;;  %v925_v6 = vld [vmem:[#allocation8 + $0x1b8] sm:$0xff] }
 0x239   :  { %v924_v4 = vld [vmem:[#allocation8 + $0x1b0] sm:$0xff] }
 0x23e   :  { %v2023_v0 = vpop.permute.xlu1 %894  ;;  %v757_v37 = vpop.permute.xlu2 %756 }
 0x23f   :  { %v2025_v53 = vpop.permute.xlu0 %794  ;;  %v762_v21 = vsel %vm758_vm14, %v1940_v59, %v757_v37  ;;  %v766_v33 = vsel %vm758_vm14, %v757_v37, %v1940_v59  ;;  %v874_v59 = vld [vmem:[#allocation8 + $0x170] sm:$0xff]  ;;  %v875_v37 = vld [vmem:[#allocation8 + $0x178] sm:$0xff] }
 0x240   :  { %v782_v27 = vmul.f32 %v774_v16, %v766_v33  ;;  %v783_v30 = vmul.f32 %v775_v51, %v762_v21  ;;  %v974_v21 = vld [vmem:[#allocation8 + $0x1f0] sm:$0xff]  ;;  %v975_v33 = vld [vmem:[#allocation8 + $0x1f8] sm:$0xff] }
 0x246   :  { %v807_v38 = vpop.permute.xlu1 %806  ;;  %v907_v17 = vpop.permute.xlu2 %906 }
 0x247   :  { %v2027_v39 = vpop.permute.xlu0 %944  ;;  %v812_v26 = vsel %vm808_vm4, %v1950_v1, %v807_v38  ;;  %v816_v25 = vsel %vm808_vm4, %v807_v38, %v1950_v1  ;;  %v912_v1 = vsel %vm908_vm0, %v1983_v60, %v907_v17  ;;  %v916_v38 = vsel %vm908_vm0, %v907_v17, %v1983_v60 }
 0x248   :  { %v832_v50 = vmul.f32 %v824_v24, %v816_v25  ;;  %v611_v25 = vld [vmem:[#allocation8 + $0x110] sm:$0xff] }
 0x24e   :  { %v2029_v19 = vpop.permute.xlu1 %956  ;;  %v2033_v47 = vpop.permute.xlu2 %752 }
 0x24f   :  { %v2031_v40 = vpop.permute.xlu0 %994  ;;  %v962_v60 = vsel %vm958_vm2, %v1987_v48, %v2029_v19 }
 0x256   :  { %v2035_v44 = vpop.permute.xlu1 %651 }
 0x257   :  { %v656_v3 = vpop.permute.xlu0 %655 }
 0x258   :  { %v663_v9 = vsel %vm659_vm1, %v1928_v57, %v656_v3  ;;  %v667_v62 = vsel %vm659_vm1, %v656_v3, %v1928_v57  ;;  %v825_v57 = vld [vmem:[#allocation8 + $0xf8] sm:$0xff] }
 0x259   :  { %v682_v13 = vmul.f32 %v674_v56, %v667_v62  ;;  %v683_v14 = vmul.f32 %v675_v63, %v663_v9  ;;  %v833_v54 = vmul.f32 %v825_v57, %v812_v26  ;;  %v2065_v56 = vpop.permute.xlu2 %902  ;;  %v982_v57 = vmul.f32 %v974_v21, %v962_v60 }
 0x25b   :  { %v690_v49 = vadd.f32 %v682_v13, %v639_v11  ;;  %v691_v10 = vadd.f32 %v683_v14, %v640_v12  ;;  %v932_v13 = vmul.f32 %v924_v4, %v912_v1  ;;  %v933_v14 = vmul.f32 %v925_v6, %v916_v38  ;;  %v628_v4 = vld [vmem:[#allocation10 + $0x18] sm:$0xff] }
 0x25d   :  { %v740_v45 = vadd.f32 %v732_v22, %v690_v49  ;;  %v741_v46 = vadd.f32 %v733_v23, %v691_v10  ;;  %v1024_v49 = vld [vmem:[#allocation8 + $0x230] sm:$0xff]  ;;  %v1025_v10 = vld [vmem:[#allocation8 + $0x238] sm:$0xff] }
 0x25e   :  { %v2063_v5 = vpop.permute.xlu1 %802 }
 0x25f   :  { %v857_v7 = vpop.permute.xlu0 %856  ;;  %v790_v63 = vadd.f32 %v782_v27, %v740_v45  ;;  %v791_v3 = vadd.f32 %v783_v30, %v741_v46  ;;  %v612_v27 = vld [vmem:[#allocation8 + $0x118] sm:$0xff]  ;;  %v661_v30 = vsel %vm659_vm1, %v2017_v29, %v2035_v44  ;;  %v670_v46 = vld [vmem:[#allocation8 + $0x10] sm:$0xff] }
 0x260   :  { %v862_v8 = vsel %vm858_vm5, %v1902_v42, %v857_v7  ;;  %v866_v34 = vsel %vm858_vm5, %v857_v7, %v1902_v42  ;;  %v966_v42 = vsel %vm958_vm2, %v2029_v19, %v1987_v48  ;;  %v665_v48 = vsel %vm659_vm1, %v2035_v44, %v2017_v29  ;;  %v627_v44 = vld [vmem:[#allocation10 + $0x10] sm:$0xff] }
 0x261   :  { %v840_v9 = vadd.f32 %v832_v50, %v790_v63  ;;  %v841_v62 = vadd.f32 %v833_v54, %v791_v3  ;;  %v882_v11 = vmul.f32 %v874_v59, %v862_v8  ;;  %v883_v12 = vmul.f32 %v875_v37, %v866_v34  ;;  %v671_v59 = vld [vmem:[#allocation8 + $0x18] sm:$0xff]  ;;  %v2104_v37 = vpop.permute.xlu2 %696 }
 0x262   :  { %v983_v26 = vmul.f32 %v975_v33, %v966_v42  ;;  %v619_v3 = vmul.f32 %v611_v25, %v1827_v43  ;;  %v620_v29 = vmul.f32 %v612_v27, %v1864_v61  ;;  %v678_v38 = vmul.f32 %v670_v46, %v665_v48  ;;  %v771_v33 = vld [vmem:[#allocation8 + $0x98] sm:$0xff] }
 0x263   :  { %v890_v16 = vadd.f32 %v882_v11, %v840_v9  ;;  %v891_v51 = vadd.f32 %v883_v12, %v841_v62  ;;  %v720_v62 = vld [vmem:[#allocation8 + $0x50] sm:$0xff]  ;;  %v721_v11 = vld [vmem:[#allocation8 + $0x58] sm:$0xff] }
 0x264   :  { %v770_v12 = vld [vmem:[#allocation8 + $0x90] sm:$0xff]  ;;  %v821_v48 = vld [vmem:[#allocation8 + $0xd8] sm:$0xff] }
 0x265   :  { %v940_v17 = vadd.f32 %v932_v13, %v890_v16  ;;  %v941_v22 = vadd.f32 %v933_v14, %v891_v51  ;;  %v760_v13 = vsel %vm758_vm14, %v2015_v28, %v2033_v47  ;;  %v764_v14 = vsel %vm758_vm14, %v2033_v47, %v2015_v28 }
 0x266   :  { %v2087_v23 = vpop.permute.xlu1 %952  ;;  %v635_v16 = vadd.f32 %v627_v44, %v619_v3  ;;  %v636_v51 = vadd.f32 %v628_v4, %v620_v29  ;;  %v778_v47 = vmul.f32 %v770_v12, %v764_v14  ;;  %v870_v4 = vld [vmem:[#allocation8 + $0x150] sm:$0xff] }
 0x267   :  { %v1007_v24 = vpop.permute.xlu0 %1006  ;;  %v990_v7 = vadd.f32 %v982_v57, %v940_v17  ;;  %v991_v50 = vadd.f32 %v983_v26, %v941_v22  ;;  %v820_v57 = vld [vmem:[#allocation8 + $0xd0] sm:$0xff]  ;;  %v814_v26 = vsel %vm808_vm4, %v2063_v5, %v2025_v53 }
 0x268   :  { %v1012_v19 = vsel %vm1008_vm6, %v1926_v55, %v1007_v24  ;;  %v1016_v45 = vsel %vm1008_vm6, %v1007_v24, %v1926_v55  ;;  %v679_v55 = vmul.f32 %v671_v59, %v661_v30  ;;  %v779_v30 = vmul.f32 %v771_v33, %v760_v13 }
 0x269   :  { %v1032_v54 = vmul.f32 %v1024_v49, %v1012_v19  ;;  %v1033_v63 = vmul.f32 %v1025_v10, %v1016_v45  ;;  %v686_v49 = vadd.f32 %v678_v38, %v635_v16  ;;  %v2144_v46 = vpop.permute.xlu2 %846  ;;  %v871_v38 = vld [vmem:[#allocation8 + $0x158] sm:$0xff] }
 0x26a   :  { %v687_v10 = vadd.f32 %v679_v55, %v636_v51  ;;  %v970_v51 = vld [vmem:[#allocation8 + $0x1d0] sm:$0xff] }
 0x26b   :  { %v2108_v6 = vadd.f32 %v1032_v54, %v990_v7  ;;  %v2110_v1 = vadd.f32 %v1033_v63, %v991_v50  ;;  %v828_v50 = vmul.f32 %v820_v57, %v814_v26 }
 0x26d   :  { %v1048_v8 = vand.u32 2147483647, %v2108_v6  ;;  %v1049_v34 = vand.u32 2147483647, %v2110_v1  ;;  %vm1224_vm7 = vcmp.ge.f32.partialorder %v2108_v6, 0.0  ;;  %vm1225_vm8 = vcmp.ge.f32.partialorder %v2110_v1, 0.0 }
 0x26e   :  { %v2114_v9 = vpop.permute.xlu1 %645 }
 0x26f   :  { %v703_v21 = vpop.permute.xlu0 %702  ;;  %v2124_v60 = vmul.f32 0.70710677, %v1048_v8  ;;  %v2126_v42 = vmul.f32 0.70710677, %v1049_v34  ;;  %v920_v8 = vld [vmem:[#allocation8 + $0x190] sm:$0xff]  ;;  %v921_v34 = vld [vmem:[#allocation8 + $0x198] sm:$0xff] }
 0x270   :  { %v710_v17 = vsel %vm708_vm3, %v1985_v20, %v703_v21  ;;  %v714_v22 = vsel %vm708_vm3, %v703_v21, %v1985_v20  ;;  %v810_v20 = vsel %vm808_vm4, %v2025_v53, %v2063_v5  ;;  %v910_v53 = vsel %vm908_vm0, %v2023_v0, %v2065_v56 }
 0x271   :  { %v728_v24 = vmul.f32 %v720_v62, %v714_v22  ;;  %v729_v28 = vmul.f32 %v721_v11, %v710_v17  ;;  %v1064_v25 = vmul.f32 0.3275911, %v2124_v60  ;;  %v1065_v27 = vmul.f32 0.3275911, %v2126_v42 }
 0x272   :  { %v829_v3 = vmul.f32 %v821_v48, %v810_v20  ;;  %v914_v62 = vsel %vm908_vm0, %v2065_v56, %v2023_v0  ;;  %v928_v16 = vmul.f32 %v920_v8, %v910_v53  ;;  %v960_v21 = vsel %vm958_vm2, %v2027_v39, %v2087_v23  ;;  %v971_v0 = vld [vmem:[#allocation8 + $0x1d8] sm:$0xff]  ;;  %v613_v8 = vld [vmem:[#allocation8 + $0x120] sm:$0xff] }
 0x273   :  { %v736_v19 = vadd.f32 %v728_v24, %v686_v49  ;;  %v737_v45 = vadd.f32 %v729_v28, %v687_v10  ;;  %v1072_v59 = vadd.f32 1.0, %v1064_v25  ;;  %v1073_v7 = vadd.f32 1.0, %v1065_v27 }
 0x274   :  { %v929_v17 = vmul.f32 %v921_v34, %v914_v62  ;;  %v964_v56 = vsel %vm958_vm2, %v2087_v23, %v2027_v39  ;;  %v978_v24 = vmul.f32 %v970_v51, %v960_v21  ;;  %v614_v62 = vld [vmem:[#allocation8 + $0x128] sm:$0xff] }
 0x275   :  { %v786_v54 = vadd.f32 %v778_v47, %v736_v19  ;;  %v787_v63 = vadd.f32 %v779_v30, %v737_v45  ;;  %1398 = vrcp.f32 %v1072_v59  ;;  %v2170_v47 = vpop.permute.xlu2 %996  ;;  %v979_v27 = vmul.f32 %v971_v0, %v964_v56  ;;  %v629_v56 = vld [vmem:[#allocation10 + $0x20] sm:$0xff] }
 0x276   :  { %v2146_v29 = vpop.permute.xlu1 %746  ;;  %1400 = vrcp.f32 %v1073_v7 }
 0x277   :  { %v836_v44 = vadd.f32 %v828_v50, %v786_v54  ;;  %v853_v55 = vpop.permute.xlu0 %852  ;;  %v837_v5 = vadd.f32 %v829_v3, %v787_v63  ;;  %v1185_v50 = vsub.f32 0.0, %v2126_v42 }
 0x278   :  { %v860_v11 = vsel %vm858_vm5, %v1997_v52, %v853_v55  ;;  %v864_v12 = vsel %vm858_vm5, %v853_v55, %v1997_v52 }
 0x279   :  { %v878_v13 = vmul.f32 %v870_v4, %v860_v11  ;;  %v879_v14 = vmul.f32 %v871_v38, %v864_v12  ;;  %v1193_v55 = vmul.f32 %v1185_v50, %v2126_v42  ;;  %v622_v42 = vmul.f32 %v614_v62, %v1931_v58  ;;  %v773_v50 = vld [vmem:[#allocation8 + $0xa8] sm:$0xff] }
 0x27b   :  { %v1399_v33 = vpop.eup %1398  ;;  %v886_v22 = vadd.f32 %v878_v13, %v836_v44  ;;  %v887_v49 = vadd.f32 %v879_v14, %v837_v5  ;;  %v621_v14 = vmul.f32 %v613_v8, %v1894_v35  ;;  %v1208_v21 = vmul.f32 1.442695, %v1193_v55 }
 0x27c   :  { %v1401_v52 = vpop.eup %1400  ;;  %v1088_v10 = vmul.f32 %v1399_v33, %v1072_v59  ;;  %v1184_v59 = vsub.f32 0.0, %v2124_v60 }
 0x27d   :  { %v1089_v28 = vmul.f32 %v1401_v52, %v1073_v7  ;;  %v936_v57 = vadd.f32 %v928_v16, %v886_v22  ;;  %v937_v26 = vadd.f32 %v929_v17, %v887_v49  ;;  %v755_v34 = vpop.permute.xlu2 %754  ;;  %v673_v16 = vld [vmem:[#allocation8 + $0x28] sm:$0xff] }
 0x27e   :  { %v2172_v25 = vpop.permute.xlu1 %896  ;;  %v1096_v30 = vsub.f32 2.0, %v1088_v10  ;;  %v1192_v44 = vmul.f32 %v1184_v59, %v2124_v60  ;;  %v630_v22 = vld [vmem:[#allocation10 + $0x28] sm:$0xff] }
 0x27f   :  { %v2174_v48 = vpop.permute.xlu0 %796  ;;  %v1097_v20 = vsub.f32 2.0, %v1089_v28  ;;  %v2176_v19 = vadd.f32 %v978_v24, %v936_v57  ;;  %v2178_v23 = vadd.f32 %v979_v27, %v937_v26  ;;  %v723_v57 = vld [vmem:[#allocation8 + $0x68] sm:$0xff]  ;;  %v637_v27 = vadd.f32 %v629_v56, %v621_v14 }
 0x280   :  { %v1104_v39 = vmul.f32 %v1399_v33, %v1096_v30  ;;  %v1206_v13 = vmul.f32 1.442695, %v1192_v44  ;;  %v672_v33 = vld [vmem:[#allocation8 + $0x20] sm:$0xff]  ;;  %v638_v30 = vadd.f32 %v630_v22, %v622_v42 }
 0x281   :  { %v1105_v45 = vmul.f32 %v1401_v52, %v1097_v20  ;;  %v722_v20 = vld [vmem:[#allocation8 + $0x60] sm:$0xff] }
 0x282   :  { %v1112_v7 = vmul.f32 1.0614054, %v1104_v39  ;;  %1402 = vpow2.f32 %v1206_v13  ;;  %v772_v44 = vld [vmem:[#allocation8 + $0xa0] sm:$0xff] }
 0x283   :  { %v1113_v54 = vmul.f32 1.0614054, %v1105_v45  ;;  %1404 = vpow2.f32 %v1208_v21 }
 0x284   :  { %v1120_v63 = vadd.f32 -1.4531521, %v1112_v7 }
 0x285   :  { %v1121_v3 = vadd.f32 -1.4531521, %v1113_v54  ;;  %v765_v54 = vsel %vm758_vm14, %v755_v34, %v2146_v29 }
 0x286   :  { %v654_v4 = vpop.permute.xlu1 %653  ;;  %v1128_v38 = vmul.f32 %v1120_v63, %v1104_v39 }
 0x287   :  { %v2184_v53 = vpop.permute.xlu0 %946  ;;  %v1129_v5 = vmul.f32 %v1121_v3, %v1105_v45  ;;  %v662_v60 = vsel %vm659_vm1, %v2114_v9, %v654_v4  ;;  %v666_v17 = vsel %vm659_vm1, %v654_v4, %v2114_v9  ;;  %v761_v9 = vsel %vm758_vm14, %v2146_v29, %v755_v34 }
 0x288   :  { %v1136_v11 = vadd.f32 1.4214138, %v1128_v38  ;;  %v681_v52 = vmul.f32 %v673_v16, %v662_v60  ;;  %v680_v24 = vmul.f32 %v672_v33, %v666_v17  ;;  %v781_v13 = vmul.f32 %v773_v50, %v761_v9  ;;  %v1403_v29 = vpop.eup %1402  ;;  %v823_v60 = vld [vmem:[#allocation8 + $0xe8] sm:$0xff] }
 0x289   :  { %v1137_v12 = vadd.f32 1.4214138, %v1129_v5  ;;  %v905_v5 = vpop.permute.xlu2 %904  ;;  %v780_v16 = vmul.f32 %v772_v44, %v765_v54  ;;  %v1405_v42 = vpop.eup %1404 }
 0x28a   :  { %v1144_v51 = vmul.f32 %v1136_v11, %v1104_v39  ;;  %v689_v4 = vadd.f32 %v681_v52, %v638_v30  ;;  %v688_v62 = vadd.f32 %v680_v24, %v637_v27  ;;  %v911_v17 = vsel %vm908_vm0, %v2172_v25, %v905_v5  ;;  %v872_v24 = vld [vmem:[#allocation8 + $0x160] sm:$0xff]  ;;  %v923_v30 = vld [vmem:[#allocation8 + $0x1a8] sm:$0xff] }
 0x28b   :  { %v1145_v0 = vmul.f32 %v1137_v12, %v1105_v45 }
 0x28c   :  { %v1152_v49 = vadd.f32 -0.28449672, %v1144_v51 }
 0x28d   :  { %v1153_v10 = vadd.f32 -0.28449672, %v1145_v0  ;;  %v822_v0 = vld [vmem:[#allocation8 + $0xe0] sm:$0xff] }
 0x28e   :  { %v805_v28 = vpop.permute.xlu1 %804  ;;  %v1160_v26 = vmul.f32 %v1152_v49, %v1104_v39 }
 0x28f   :  { %v705_v59 = vpop.permute.xlu0 %704  ;;  %v1161_v7 = vmul.f32 %v1153_v10, %v1105_v45  ;;  %v811_v51 = vsel %vm808_vm4, %v2174_v48, %v805_v28 }
 0x290   :  { %v711_v63 = vsel %vm708_vm3, %v2104_v37, %v705_v59  ;;  %v1168_v3 = vadd.f32 0.2548296, %v1160_v26  ;;  %v715_v38 = vsel %vm708_vm3, %v705_v59, %v2104_v37  ;;  %v922_v37 = vld [vmem:[#allocation8 + $0x1a0] sm:$0xff]  ;;  %v831_v10 = vmul.f32 %v823_v60, %v811_v51 }
 0x291   :  { %v731_v55 = vmul.f32 %v723_v57, %v711_v63  ;;  %v1169_v8 = vadd.f32 0.2548296, %v1161_v7  ;;  %v730_v11 = vmul.f32 %v722_v20, %v715_v38  ;;  %v873_v57 = vld [vmem:[#allocation8 + $0x168] sm:$0xff]  ;;  %v915_v20 = vsel %vm908_vm0, %v905_v5, %v2172_v25  ;;  %v972_v38 = vld [vmem:[#allocation8 + $0x1e0] sm:$0xff] }
 0x292   :  { %v1176_v12 = vmul.f32 %v1168_v3, %v1104_v39  ;;  %v815_v39 = vsel %vm808_vm4, %v805_v28, %v2174_v48  ;;  %v930_v48 = vmul.f32 %v922_v37, %v911_v17  ;;  %v931_v25 = vmul.f32 %v923_v30, %v915_v20  ;;  %v1023_v37 = vld [vmem:[#allocation8 + $0x228] sm:$0xff] }
 0x293   :  { %v739_v14 = vadd.f32 %v731_v55, %v689_v4  ;;  %v1177_v34 = vmul.f32 %v1169_v8, %v1105_v45  ;;  %v738_v21 = vadd.f32 %v730_v11, %v688_v62  ;;  %v830_v28 = vmul.f32 %v822_v0, %v815_v39  ;;  %v973_v62 = vld [vmem:[#allocation8 + $0x1e8] sm:$0xff] }
 0x294   :  { %v1216_v33 = vmul.f32 %v1403_v29, %v1176_v12  ;;  %v1021_v29 = vld [vmem:[#allocation8 + $0x218] sm:$0xff] }
 0x295   :  { %v789_v45 = vadd.f32 %v781_v13, %v739_v14  ;;  %v1217_v56 = vmul.f32 %v1405_v42, %v1177_v34  ;;  %v788_v22 = vadd.f32 %v780_v16, %v738_v21  ;;  %v1020_v14 = vld [vmem:[#allocation8 + $0x210] sm:$0xff] }
 0x296   :  { %v955_v49 = vpop.permute.xlu1 %954  ;;  %v1232_v52 = vmul.f32 0.5, %v1216_v33 }
 0x297   :  { %v855_v26 = vpop.permute.xlu0 %854  ;;  %v1233_v27 = vmul.f32 0.5, %v1217_v56  ;;  %v839_v7 = vadd.f32 %v831_v10, %v789_v45  ;;  %v838_v63 = vadd.f32 %v830_v28, %v788_v22  ;;  %v961_v55 = vsel %vm958_vm2, %v2184_v53, %v955_v49 }
 0x298   :  { %v1240_v59 = vsub.f32 1.0, %v1232_v52  ;;  %v861_v50 = vsel %vm858_vm5, %v2144_v46, %v855_v26  ;;  %v865_v9 = vsel %vm858_vm5, %v855_v26, %v2144_v46  ;;  %v965_v8 = vsel %vm958_vm2, %v955_v49, %v2184_v53 }
 0x299   :  { %v1241_v54 = vsub.f32 1.0, %v1233_v27  ;;  %v880_v3 = vmul.f32 %v872_v24, %v861_v50  ;;  %v881_v44 = vmul.f32 %v873_v57, %v865_v9  ;;  %v980_v34 = vmul.f32 %v972_v38, %v961_v55  ;;  %v1018_v50 = vld [vmem:[#allocation8 + $0x200] sm:$0xff] }
 0x29a   :  { %v1248_v4 = vsel %vm1224_vm7, %v1240_v59, %v1232_v52  ;;  %v981_v42 = vmul.f32 %v973_v62, %v965_v8 }
 0x29b   :  { %v1249_v46 = vsel %vm1225_vm8, %v1241_v54, %v1233_v27  ;;  %v1256_v5 = vmul.f32 %v1248_v4, %v2108_v6  ;;  %v888_v11 = vadd.f32 %v880_v3, %v838_v63  ;;  %v889_v12 = vadd.f32 %v881_v44, %v839_v7  ;;  %v1019_v4 = vld [vmem:[#allocation8 + $0x208] sm:$0xff] }
 0x29c   :  { %v1257_v13 = vmul.f32 %v1249_v46, %v2110_v1  ;;  %v1022_v1 = vld [vmem:[#allocation8 + $0x220] sm:$0xff] }
 0x29d   :  { %v938_v16 = vadd.f32 %v930_v48, %v888_v11  ;;  %v939_v60 = vadd.f32 %v931_v25, %v889_v12  ;;  %v1264_v21 = vadd.f32 %v1256_v5, %v1757_v41  ;;  %v993_v48 = vpop.permute.xlu2 %992 }
 0x29e   :  { %v1003_v51 = vpop.permute.xlu1 %1002  ;;  %v1265_v33 = vadd.f32 %v1257_v13, %v1846_v15 }
 0x29f   :  { %v1010_v53 = vsel %vm1008_vm6, %v2031_v40, %v1003_v51  ;;  %v1014_v6 = vsel %vm1008_vm6, %v1003_v51, %v2031_v40  ;;  %v1005_v17 = vpop.permute.xlu0 %1004  ;;  %1285 = vmatpush.msra.mxu2 %v1264_v21  ;;  %v988_v45 = vadd.f32 %v980_v34, %v938_v16  ;;  %v989_v41 = vadd.f32 %v981_v42, %v939_v60 }
 0x2a0   :  { %v1028_v0 = vmul.f32 %v1020_v14, %v1010_v53  ;;  %v1029_v39 = vmul.f32 %v1021_v29, %v1014_v6  ;;  %1305 = vmatpush.msra.mxu3 %v1265_v33  ;;  %v1011_v56 = vsel %vm1008_vm6, %v2170_v47, %v1005_v17  ;;  %v1015_v22 = vsel %vm1008_vm6, %v1005_v17, %v2170_v47 }
 0x2a1   :  { %v1030_v49 = vmul.f32 %v1022_v1, %v1011_v56  ;;  %v1031_v52 = vmul.f32 %v1023_v37, %v1015_v22 }
 0x2a2   :  { %v2253_v40 = vadd.f32 %v1028_v0, %v2176_v19  ;;  %v2256_v15 = vadd.f32 %v1029_v39, %v2178_v23 }
 0x2a3   :  { %v2260_v57 = vadd.f32 %v1030_v49, %v988_v45  ;;  %v2262_v26 = vadd.f32 %v1031_v52, %v989_v41 }
 0x2a4   :  { %v1044_v10 = vand.u32 2147483647, %v2253_v40  ;;  %v1045_v24 = vand.u32 2147483647, %v2256_v15  ;;  %vm1220_vm9 = vcmp.ge.f32.partialorder %v2253_v40, 0.0  ;;  %vm1221_vm10 = vcmp.ge.f32.partialorder %v2256_v15, 0.0 }
 0x2a5   :  { %v1046_v47 = vand.u32 2147483647, %v2260_v57  ;;  %v1047_v19 = vand.u32 2147483647, %v2262_v26  ;;  %vm1222_vm11 = vcmp.ge.f32.partialorder %v2260_v57, 0.0  ;;  %vm1223_vm12 = vcmp.ge.f32.partialorder %v2262_v26, 0.0 }
 0x2a6   :  { %v1052_v27 = vmul.f32 0.70710677, %v1044_v10  ;;  %v1053_v30 = vmul.f32 0.70710677, %v1045_v24 }
 0x2a7   :  { %v1001_v20 = vpop.permute.xlu0 %1000  ;;  %v1054_v59 = vmul.f32 0.70710677, %v1046_v47  ;;  %v1055_v7 = vmul.f32 0.70710677, %v1047_v19 }
 0x2a8   :  { %v1060_v23 = vmul.f32 0.3275911, %v1052_v27  ;;  %v1061_v28 = vmul.f32 0.3275911, %v1053_v30  ;;  %v1009_v9 = vsel %vm1008_vm6, %v993_v48, %v1001_v20  ;;  %v1013_v25 = vsel %vm1008_vm6, %v1001_v20, %v993_v48 }
 0x2a9   :  { %v1062_v3 = vmul.f32 0.3275911, %v1054_v59  ;;  %v1063_v44 = vmul.f32 0.3275911, %v1055_v7  ;;  %v1026_v38 = vmul.f32 %v1018_v50, %v1009_v9  ;;  %v1027_v46 = vmul.f32 %v1019_v4, %v1013_v25 }
 0x2aa   :  { %v1068_v54 = vadd.f32 1.0, %v1060_v23  ;;  %v1069_v63 = vadd.f32 1.0, %v1061_v28  ;;  %v1180_v34 = vsub.f32 0.0, %v1052_v27  ;;  %v1181_v1 = vsub.f32 0.0, %v1053_v30 }
 0x2ab   :  { %v1070_v55 = vadd.f32 1.0, %v1062_v3  ;;  %v1071_v8 = vadd.f32 1.0, %v1063_v44  ;;  %v2271_v5 = vadd.f32 %v1026_v38, %v2021_v36  ;;  %v2274_v62 = vadd.f32 %v1027_v46, %v2019_v31 }
 0x2ac   :  { %1406 = vrcp.f32 %v1068_v54  ;;  %v1188_v37 = vmul.f32 %v1180_v34, %v1052_v27  ;;  %v1182_v56 = vsub.f32 0.0, %v1054_v59  ;;  %v1183_v52 = vsub.f32 0.0, %v1055_v7 }
 0x2ad   :  { %1408 = vrcp.f32 %v1069_v63  ;;  %v1042_v11 = vand.u32 2147483647, %v2271_v5  ;;  %v1043_v32 = vand.u32 2147483647, %v2274_v62  ;;  %v1189_v19 = vmul.f32 %v1181_v1, %v1053_v30 }
 0x2ae   :  { %1410 = vrcp.f32 %v1070_v55  ;;  %v1198_v27 = vmul.f32 1.442695, %v1188_v37  ;;  %v1190_v9 = vmul.f32 %v1182_v56, %v1054_v59  ;;  %vm1218_vm13 = vcmp.ge.f32.partialorder %v2271_v5, 0.0 }
 0x2af   :  { %1412 = vrcp.f32 %v1071_v8  ;;  %v2278_v13 = vmul.f32 0.70710677, %v1042_v11  ;;  %v2280_v60 = vmul.f32 0.70710677, %v1043_v32  ;;  %v1200_v30 = vmul.f32 1.442695, %v1189_v19 }
 0x2b0   :  { %v1202_v59 = vmul.f32 1.442695, %v1190_v9  ;;  %vm1219_vm14 = vcmp.ge.f32.partialorder %v2274_v62, 0.0 }
 0x2b1   :  { %v1058_v36 = vmul.f32 0.3275911, %v2278_v13  ;;  %v1059_v42 = vmul.f32 0.3275911, %v2280_v60 }
 0x2b2   :  { %v1407_v12 = vpop.eup %1406 }
 0x2b3   :  { %v1409_v14 = vpop.eup %1408  ;;  %v1084_v29 = vmul.f32 %v1407_v12, %v1068_v54  ;;  %v1066_v53 = vadd.f32 1.0, %v1058_v36  ;;  %v1067_v45 = vadd.f32 1.0, %v1059_v42  ;;  %v1191_v54 = vmul.f32 %v1183_v52, %v1055_v7 }
 0x2b4   :  { %v1085_v16 = vmul.f32 %v1409_v14, %v1069_v63  ;;  %v1411_v21 = vpop.eup %1410 }
 0x2b5   :  { %v1092_v51 = vsub.f32 2.0, %v1084_v29  ;;  %v1413_v6 = vpop.eup %1412  ;;  %v1086_v17 = vmul.f32 %v1411_v21, %v1070_v55  ;;  %1414 = vrcp.f32 %v1066_v53  ;;  %v1204_v7 = vmul.f32 1.442695, %v1191_v54 }
 0x2b6   :  { %v1093_v31 = vsub.f32 2.0, %v1085_v16  ;;  %v1087_v39 = vmul.f32 %v1413_v6, %v1071_v8  ;;  %1416 = vrcp.f32 %v1067_v45 }
 0x2b7   :  { %v2284_v33 = vmul.f32 %v1407_v12, %v1092_v51  ;;  %v1094_v41 = vsub.f32 2.0, %v1086_v17  ;;  %1418 = vpow2.f32 %v1198_v27 }
 0x2b8   :  { %v2286_v0 = vmul.f32 %v1409_v14, %v1093_v31  ;;  %v1095_v49 = vsub.f32 2.0, %v1087_v39  ;;  %1420 = vpow2.f32 %v1200_v30  ;;  %v1179_v39 = vsub.f32 0.0, %v2280_v60 }
 0x2b9   :  { %v1108_v22 = vmul.f32 1.0614054, %v2284_v33  ;;  %v2290_v24 = vmul.f32 %v1411_v21, %v1094_v41  ;;  %v1178_v21 = vsub.f32 0.0, %v2278_v13  ;;  %1422 = vpow2.f32 %v1202_v59 }
 0x2ba   :  { %v1109_v10 = vmul.f32 1.0614054, %v2286_v0  ;;  %v2292_v20 = vmul.f32 %v1413_v6, %v1095_v49  ;;  %1424 = vpow2.f32 %v1204_v7 }
 0x2bb   :  { %v1116_v47 = vadd.f32 -1.4531521, %v1108_v22  ;;  %v1110_v23 = vmul.f32 1.0614054, %v2290_v24  ;;  %v1415_v50 = vpop.eup %1414  ;;  %v1186_v52 = vmul.f32 %v1178_v21, %v2278_v13 }
 0x2bc   :  { %v1117_v48 = vadd.f32 -1.4531521, %v1109_v10  ;;  %v1111_v63 = vmul.f32 1.0614054, %v2292_v20  ;;  %v1082_v44 = vmul.f32 %v1415_v50, %v1066_v53  ;;  %v1417_v38 = vpop.eup %1416 }
 0x2bd   :  { %v1124_v28 = vmul.f32 %v1116_v47, %v2284_v33  ;;  %v1118_v4 = vadd.f32 -1.4531521, %v1110_v23  ;;  %v1083_v46 = vmul.f32 %v1417_v38, %v1067_v45  ;;  %v1419_v17 = vpop.eup %1418 }
 0x2be   :  { %v1125_v3 = vmul.f32 %v1117_v48, %v2286_v0  ;;  %v1119_v55 = vadd.f32 -1.4531521, %v1111_v63  ;;  %v1090_v11 = vsub.f32 2.0, %v1082_v44  ;;  %v1187_v63 = vmul.f32 %v1179_v39, %v2280_v60 }
 0x2bf   :  { %v1132_v25 = vadd.f32 1.4214138, %v1124_v28  ;;  %v1126_v12 = vmul.f32 %v1118_v4, %v2290_v24  ;;  %v1091_v34 = vsub.f32 2.0, %v1083_v46  ;;  %v1421_v28 = vpop.eup %1420  ;;  %v1194_v4 = vmul.f32 1.442695, %v1186_v52 }
 0x2c0   :  { %v1133_v8 = vadd.f32 1.4214138, %v1125_v3  ;;  %v1127_v14 = vmul.f32 %v1119_v55, %v2292_v20  ;;  %v2302_v16 = vmul.f32 %v1415_v50, %v1090_v11  ;;  %v1423_v55 = vpop.eup %1422  ;;  %v1196_v60 = vmul.f32 1.442695, %v1187_v63 }
 0x2c1   :  { %v1140_v32 = vmul.f32 %v1132_v25, %v2284_v33  ;;  %v1134_v36 = vadd.f32 1.4214138, %v1126_v12  ;;  %v2305_v53 = vmul.f32 %v1417_v38, %v1091_v34  ;;  %1426 = vpow2.f32 %v1194_v4 }
 0x2c2   :  { %v1141_v29 = vmul.f32 %v1133_v8, %v2286_v0  ;;  %v1135_v31 = vadd.f32 1.4214138, %v1127_v14  ;;  %v1106_v37 = vmul.f32 1.0614054, %v2302_v16  ;;  %1428 = vpow2.f32 %v1196_v60 }
 0x2c3   :  { %v1148_v51 = vadd.f32 -0.28449672, %v1140_v32  ;;  %v1142_v6 = vmul.f32 %v1134_v36, %v2290_v24  ;;  %v1107_v19 = vmul.f32 1.0614054, %v2305_v53  ;;  %v1425_v32 = vpop.eup %1424 }
 0x2c4   :  { %v1149_v42 = vadd.f32 -0.28449672, %v1141_v29  ;;  %v1143_v45 = vmul.f32 %v1135_v31, %v2292_v20  ;;  %v1114_v49 = vadd.f32 -1.4531521, %v1106_v37 }
 0x2c5   :  { %v1156_v1 = vmul.f32 %v1148_v51, %v2284_v33  ;;  %v1150_v56 = vadd.f32 -0.28449672, %v1142_v6  ;;  %v1115_v54 = vadd.f32 -1.4531521, %v1107_v19 }
 0x2c6   :  { %v1157_v41 = vmul.f32 %v1149_v42, %v2286_v0  ;;  %v1151_v10 = vadd.f32 -0.28449672, %v1143_v45  ;;  %v1122_v23 = vmul.f32 %v1114_v49, %v2302_v16 }
 0x2c7   :  { %v1164_v22 = vadd.f32 0.2548296, %v1156_v1  ;;  %v1158_v27 = vmul.f32 %v1150_v56, %v2290_v24  ;;  %v1123_v30 = vmul.f32 %v1115_v54, %v2305_v53 }
 0x2c8   :  { %v1165_v47 = vadd.f32 0.2548296, %v1157_v41  ;;  %v1159_v50 = vmul.f32 %v1151_v10, %v2292_v20  ;;  %v1130_v44 = vadd.f32 1.4214138, %v1122_v23  ;;  %v1427_v41 = vpop.eup %1426 }
 0x2c9   :  { %v1172_v48 = vmul.f32 %v1164_v22, %v2284_v33  ;;  %v1166_v13 = vadd.f32 0.2548296, %v1158_v27  ;;  %v1131_v12 = vadd.f32 1.4214138, %v1123_v30  ;;  %v1429_v23 = vpop.eup %1428 }
 0x2ca   :  { %v1173_v9 = vmul.f32 %v1165_v47, %v2286_v0  ;;  %v1167_v25 = vadd.f32 0.2548296, %v1159_v50  ;;  %v1138_v46 = vmul.f32 %v1130_v44, %v2302_v16 }
 0x2cb   :  { %v1212_v3 = vmul.f32 %v1419_v17, %v1172_v48  ;;  %v1174_v33 = vmul.f32 %v1166_v13, %v2290_v24  ;;  %v1139_v36 = vmul.f32 %v1131_v12, %v2305_v53 }
 0x2cc   :  { %v1213_v38 = vmul.f32 %v1421_v28, %v1173_v9  ;;  %v1175_v11 = vmul.f32 %v1167_v25, %v2292_v20  ;;  %v1146_v14 = vadd.f32 -0.28449672, %v1138_v46 }
 0x2cd   :  { %v1228_v8 = vmul.f32 0.5, %v1212_v3  ;;  %v1214_v59 = vmul.f32 %v1423_v55, %v1174_v33  ;;  %v1147_v20 = vadd.f32 -0.28449672, %v1139_v36  ;;  %v1268_v3 = vld [vmem:[%s2368_s8 + $0x8] sm:$0xff] }
 0x2ce   :  { %v1229_v0 = vmul.f32 0.5, %v1213_v38  ;;  %v1215_v29 = vmul.f32 %v1425_v32, %v1175_v11  ;;  %v1154_v24 = vmul.f32 %v1146_v14, %v2302_v16 }
 0x2cf   :  { %v1236_v7 = vsub.f32 1.0, %v1228_v8  ;;  %v1230_v51 = vmul.f32 0.5, %v1214_v59  ;;  %v1155_v17 = vmul.f32 %v1147_v20, %v2305_v53 }
 0x2d0   :  { %v1237_v34 = vsub.f32 1.0, %v1229_v0  ;;  %v1231_v21 = vmul.f32 0.5, %v1215_v29  ;;  %v1162_v6 = vadd.f32 0.2548296, %v1154_v24 }
 0x2d1   :  { %v1238_v31 = vsub.f32 1.0, %v1230_v51  ;;  %v1244_v42 = vsel %vm1220_vm9, %v1236_v7, %v1228_v8  ;;  %v1163_v52 = vadd.f32 0.2548296, %v1155_v17 }
 0x2d2   :  { %v1239_v1 = vsub.f32 1.0, %v1231_v21  ;;  %v1245_v37 = vsel %vm1221_vm10, %v1237_v34, %v1229_v0  ;;  %v1170_v45 = vmul.f32 %v1162_v6, %v2302_v16  ;;  %v1252_v49 = vmul.f32 %v1244_v42, %v2253_v40 }
 0x2d3   :  { %v1246_v39 = vsel %vm1222_vm11, %v1238_v31, %v1230_v51  ;;  %v1253_v47 = vmul.f32 %v1245_v37, %v2256_v15  ;;  %v1171_v48 = vmul.f32 %v1163_v52, %v2305_v53 }
 0x2d4   :  { %v1254_v56 = vmul.f32 %v1246_v39, %v2260_v57  ;;  %v1247_v22 = vsel %vm1223_vm12, %v1239_v1, %v1231_v21  ;;  %v1210_v19 = vmul.f32 %v1427_v41, %v1170_v45  ;;  %v1260_v57 = vadd.f32 %v1252_v49, %v1827_v43  ;;  %v1266_v43 = vld [vmem:[%s2367_s7] sm:$0xff]  ;;  %s1597_s7 = smov [#allocation11]  }
 0x2d5   :  { %v1255_v10 = vmul.f32 %v1247_v22, %v2262_v26  ;;  %v1211_v50 = vmul.f32 %v1429_v23, %v1171_v48  ;;  %v1261_v40 = vadd.f32 %v1253_v47, %v1864_v61  ;;  %s1320_s10 = sshll.u32 %s1597_s7, 4  ;;  %s1321_s10 = int_to_ptr.vmem [resolvable:$true] %s1320_s10 }
 0x2d6   :  { %v1262_v27 = vadd.f32 %v1254_v56, %v1894_v35  ;;  %v1226_v16 = vmul.f32 0.5, %v1210_v19 }
 0x2d7   :  { %v1263_v28 = vadd.f32 %v1255_v10, %v1931_v58  ;;  %v1227_v15 = vmul.f32 0.5, %v1211_v50 }
 0x2d8   :  { %1286 = vmatpush.msra.mxu2 %v1262_v27  ;;  %v1234_v9 = vsub.f32 1.0, %v1226_v16 }
 0x2d9   :  { %1306 = vmatpush.msra.mxu3 %v1263_v28  ;;  %v1235_v53 = vsub.f32 1.0, %v1227_v15 }
 0x2da   :  { %1287 = vmatpush.msra.mxu2 %v1260_v57  ;;  %v1242_v35 = vsel %vm1218_vm13, %v1234_v9, %v1226_v16 }
 0x2db   :  { %1307 = vmatpush.msra.mxu3 %v1261_v40  ;;  %v1250_v26 = vmul.f32 %v1242_v35, %v2271_v5  ;;  %v1243_v54 = vsel %vm1219_vm14, %v1235_v53, %v1227_v15  ;;  %v1267_v5 = vld [vmem:[%s2368_s8] sm:$0xff] }
 0x2dc   :  { %v1251_v61 = vmul.f32 %v1243_v54, %v2274_v62 }
 0x2dd   :  { %v1258_v58 = vadd.f32 %v1250_v26, %v1730_v18 }
 0x2de   :  { %v1259_v63 = vadd.f32 %v1251_v61, %v1786_v2 }
 0x2df   :  { %1288 = vmatpush.msra.mxu2 %v1258_v58 }
 0x2e0   :  { %1342 = vmatmul.msk.f32.vlgmr.msra.gmra.mxu2 %vm1269_vm15, %v1266_v43  ;;  %1308 = vmatpush.msra.mxu3 %v1259_v63 }
 0x2e1   :  { %1343 = vmatmul.msk.f32.vlgmr.msra.gmra.mxu3 %vm1269_vm15, %v1266_v43 }
 0x363   :  { %v1290_v13 = vpop.f32.mrf.mxu2 }
 0x364   :  { %v1291_v18 = vadd.f32 %v1290_v13, %v1267_v5  ;;  %v1310_v2 = vpop.f32.mrf.mxu3 }
 0x365   :  { %v1311_v62 = vadd.f32 %v1310_v2, %v1268_v3 }
 0x366   :  { %1313 = vst [vmem:[#allocation11] sm:$0xff] %v1291_v18 }
 0x367   :  { %1314 = vst [vmem:[#allocation11 + $0x8] sm:$0xff] %v1311_v62 }
 0x368   :  { %1325 = dma.vmem_to_hbm [thread:$0]  %s1321_s10, 256, %s1323_s6, [#allocation4]  }
 0x369   :  { %1580 = dma.done.wait [#allocation4], 256  }
 0x36a   :  { %1581 = vsyncadd [#allocation4], 4294967040 }
 0x36b   :  { %1330 = vsyncpa [#allocation3], 1 }
 0x36c   :  { %1331 = vsyncpa [#allocation6], 1 }
 0x36d   :  { %1332 = vsyncpa [#allocation9], 1 }
 0x36e   :  { %1333 = vsyncpa [#allocation4], 1 }

</bundles_post_ra>
